<compile_context>
chip_gen: v5e
topology: v5e:2x2
jax: 0.10.0
libtpu: 0.0.40
codegen_flags: <defaults>
</compile_context>

<pallas_src>
import numpy as np
import jax
import jax.numpy as jnp
from jax import lax
from jax.experimental import pallas as pl
from jax.experimental.pallas import tpu as pltpu

# ---- problem sizes (small, consistent with the module) ----------------------
B = 2                          # batch
C, Hs, Ws = 3, 8, 8            # attack_dims  (small input image)
HV, WV = 16, 16                # victim spatial dims (network input canvas)
K_SMALL = C * Hs * Ws          # flattened attack input dim  = 192
D = C * HV * WV                # flattened victim input dim  = 768
K_OUT = D - K_SMALL            # canvas positions outside the window = 576
NUM_CLASSES = 10               # victim network label space
NUM_TARGET = 4                 # target-task label space (output_mapper)
NPAD = 128                     # lane-dense padded class dim (full vreg lane width)
_PH = (HV - Hs) // 2
_PW = (WV - Ws) // 2


def _window_indices():
    """Flat canvas indices covered by the centered window (in x_small flatten
    order) and their complement.  Lets the zero-pad adapter become a one-time
    row-gather of the frozen head instead of an embedding-matrix matmul."""
    src = np.arange(K_SMALL)
    c = src // (Hs * Ws)
    r = (src // Ws) % Hs
    col = src % Ws
    dst = c * (HV * WV) + (r + _PH) * WV + (col + _PW)
    outside = np.setdiff1d(np.arange(D), dst)
    assert outside.shape[0] == K_OUT
    return jnp.asarray(dst, jnp.int32), jnp.asarray(outside, jnp.int32)


_DST_IDX, _OUT_IDX = _window_indices()


# ---- Pallas kernel: adapter + program add + frozen network + softmax --------
def program_kernel(x_ref, w_in_ref, m_in_ref, w_out_ref, m_out_ref,
                   wn_in_ref, wn_out_ref, b_ref, out_ref):
    # Adversarial program P = tanh(W * mask), split into the rows under the
    # embedded window ("in", 192) and the complement rows ("out", 576).  The
    # mask multiply is kept on both halves so any mask is handled; with the
    # standard reprogramming mask (0 inside / 1 outside) P_in is identically 0.
    p_in = jnp.tanh(w_in_ref[...] * m_in_ref[...])           # (1, 192)
    p_out = jnp.tanh(w_out_ref[...] * m_out_ref[...])        # (1, 576)

    # adapter_fn fused: the padded canvas never exists — the small image only
    # ever multiplies the gathered head rows.
    x_in = x_ref[...] + p_in                                  # (B, 192)

    # Frozen head is stored bf16 in HBM (DMA savings); widen on the VPU and run
    # the tiny matmuls at full f32 precision (kernel is DMA-bound, so the extra
    # MXU passes are free).  Class dim pre-padded to 128 lanes -> lane-dense.
    wn_in = wn_in_ref[...].astype(jnp.float32)                # (192, 128)
    wn_out = wn_out_ref[...].astype(jnp.float32)              # (576, 128)
    logits = jnp.dot(x_in, wn_in, preferred_element_type=jnp.float32,
                     precision=lax.Precision.HIGHEST)         # (B, 128)
    logits = logits + jnp.dot(p_out, wn_out, preferred_element_type=jnp.float32,
                              precision=lax.Precision.HIGHEST)  # + (1,128) bcast
    logits = logits + b_ref[...]                              # pad lanes -> -1e30

    # softmax over the padded class dim: padded lanes exp() to exactly 0.
    # Exact divide (approx reciprocal removed — it bought nothing, kernel is
    # DMA-bound, and it forced a loose tolerance).
    mx = jnp.max(logits, axis=1, keepdims=True)
    ex = jnp.exp(logits - mx)
    denom = jnp.sum(ex, axis=1, keepdims=True)
    out_ref[...] = ex / denom                                 # (B, 128) lane-dense


# ---- wrappers ----------------------------------------------------------------
def prepare_network(Wn, bn):
    """One-time prep of the frozen victim head:
       * pad class dim to a full 128-lane tile (zero weight cols, -1e30 bias),
       * partition rows into window / outside positions (folds the zero-pad
         adapter into a row gather — no embedding matrix, no (B,768) canvas),
       * store weights in bf16 (halves the dominant DMA); bias stays f32."""
    Wn_pad = jnp.zeros((D, NPAD), jnp.float32).at[:, :NUM_CLASSES].set(Wn)
    bn_pad = jnp.full((1, NPAD), -1e30, dtype=jnp.float32).at[0, :NUM_CLASSES].set(bn)
    Wn_in = Wn_pad[_DST_IDX, :].astype(jnp.bfloat16)          # (192, 128)
    Wn_out = Wn_pad[_OUT_IDX, :].astype(jnp.bfloat16)         # (576, 128)
    return Wn_in, Wn_out, bn_pad


@jax.jit
def generic_program_forward(x, W, mask, Wn_in, Wn_out, bn_pad):
    """GenericProgram.forward. x: (B,C,Hs,Ws) float32 NCHW -> (B, NUM_TARGET)."""
    x_small = x.reshape(B, K_SMALL)                  # flattened attack input
    Wf = W.reshape(D)
    Mf = mask.reshape(D)
    # layout plumbing only (tiny gathers of the trainable program parameter /
    # mask into the same row order as the pre-gathered frozen head rows)
    W_in = Wf[_DST_IDX].reshape(1, K_SMALL)
    M_in = Mf[_DST_IDX].reshape(1, K_SMALL)
    W_out = Wf[_OUT_IDX].reshape(1, K_OUT)
    M_out = Mf[_OUT_IDX].reshape(1, K_OUT)

    vmem = pl.BlockSpec(memory_space=pltpu.MemorySpace.VMEM)
    cost = pl.CostEstimate(
        flops=2 * B * K_SMALL * NPAD + 2 * K_OUT * NPAD,       # ~0.25 MFLOP
        transcendentals=D + B * NPAD,                          # tanh + exp
        bytes_accessed=(D * NPAD) * 2                          # bf16 head
                       + (B * K_SMALL + 2 * D + NPAD + B * NPAD) * 4,
    )

    # Grid-less: the whole problem (~0.2 MiB of operands) fits VMEM with huge
    # margin on all of v5e/v6e/v7x, so a grid would only add prologue cost.
    # Scale-up notes (no-ops at B=2):
    #   - v7x: add a leading batch grid axis with
    #     dimension_semantics=("parallel", ...) to use both TensorCores, and
    #     re-check VMEM residency against its 64 MiB (32 MiB scoped default).
    #   - v6e: tile batch to multiples of 8 (f32) / 16 (bf16) so sublanes and
    #     MXU rows fill; give the batch axis "parallel" semantics.
    #   - v5e: keep this single unmasked 128-lane f32 store and f32 EUP math.
    probs_pad = pl.pallas_call(
        program_kernel,
        out_shape=jax.ShapeDtypeStruct((B, NPAD), jnp.float32),
        in_specs=[vmem] * 8,
        out_specs=vmem,
        cost_estimate=cost,
    )(x_small, W_in, M_in, W_out, M_out, Wn_in, Wn_out, bn_pad)

    # output_mapper: keep the first NUM_TARGET source classes as target labels.
    return probs_pad[:, :NUM_TARGET]


# ---- pure-JAX reference (silent correctness check) ---------------------------
def reference_forward(x, W, mask, Wn, bn):
    X = jnp.pad(x, ((0, 0), (0, 0), (_PH, HV - Hs - _PH), (_PW, WV - Ws - _PW)))
    X = X.reshape(B, D)
    P = jnp.tanh(W.reshape(1, D) * mask.reshape(1, D))
    logits = jnp.dot(X + P, Wn, precision=lax.Precision.HIGHEST) + bn.reshape(1, -1)
    probs = jax.nn.softmax(logits, axis=1)
    return probs[:, :NUM_TARGET]


if __name__ == "__main__":
    key = jax.random.PRNGKey(0)
    kx, kw, kwn, kb = jax.random.split(key, 4)

    # attack-task input, NCHW
    x = jax.random.normal(kx, (B, C, Hs, Ws), dtype=jnp.float32)

    # program parameter W ~ randn(victim_dims), victim_dims = (C, HV, WV)
    W = jax.random.normal(kw, (C, HV, WV), dtype=jnp.float32)

    # mask: 1 outside the embedded-image region, 0 inside
    mask = jnp.ones((C, HV, WV), dtype=jnp.float32)
    mask = mask.at[:, _PH:_PH + Hs, _PW:_PW + Ws].set(0.0)

    # frozen victim network parameters (linear classifier)
    Wn = jax.random.normal(kwn, (D, NUM_CLASSES), dtype=jnp.float32) * 0.05
    bn = jax.random.normal(kb, (NUM_CLASSES,), dtype=jnp.float32) * 0.05

    Wn_in, Wn_out, bn_pad = prepare_network(Wn, bn)   # one-time frozen-head prep

    out = generic_program_forward(x, W, mask, Wn_in, Wn_out, bn_pad)
    out = jax.block_until_ready(out)
    assert out.shape == (B, NUM_TARGET)

    # (1) tight check: reference using the SAME bf16-stored head — the kernel
    #     itself (adapter fusion, program add, matmuls, softmax) is exact.
    Wn_q = Wn.astype(jnp.bfloat16).astype(jnp.float32)
    ref_q = reference_forward(x, W, mask, Wn_q, bn)
    assert jnp.allclose(out, ref_q, atol=2e-4, rtol=2e-4), (
        f"max abs err vs bf16-head reference "
        f"{float(jnp.max(jnp.abs(out - ref_q)))}"
    )

    # (2) loose check vs the pure-f32 module semantics — residual error is
    #     solely the deliberate bf16 storage of the frozen head (DMA saving).
    ref = reference_forward(x, W, mask, Wn, bn)
    assert jnp.allclose(out, ref, atol=5e-3, rtol=5e-3), (
        f"max abs err vs f32 reference {float(jnp.max(jnp.abs(out - ref)))}"
    )

    print("KERNEL_OK")
</pallas_src>

<mosaic_0001>
module attributes {stable_mosaic.version = 11 : i64} {
  func.func @program_kernel(%arg0: memref<2x192xf32, #tpu.memory_space<vmem>>, %arg1: memref<1x192xf32, #tpu.memory_space<vmem>>, %arg2: memref<1x192xf32, #tpu.memory_space<vmem>>, %arg3: memref<1x576xf32, #tpu.memory_space<vmem>>, %arg4: memref<1x576xf32, #tpu.memory_space<vmem>>, %arg5: memref<192x128xbf16, #tpu.memory_space<vmem>>, %arg6: memref<576x128xbf16, #tpu.memory_space<vmem>>, %arg7: memref<1x128xf32, #tpu.memory_space<vmem>>, %arg8: memref<2x128xf32, #tpu.memory_space<vmem>>) attributes {dimension_semantics = [], scalar_prefetch = 0 : i64, scratch_operands = 0 : i64, tpu.core_type = #tpu.core_type<tc>} {
    %c0 = arith.constant 0 : index
    %c0_0 = arith.constant 0 : index
    %0 = vector.load %arg1[%c0, %c0_0] : memref<1x192xf32, #tpu.memory_space<vmem>>, vector<1x192xf32>
    %c0_1 = arith.constant 0 : index
    %c0_2 = arith.constant 0 : index
    %1 = vector.load %arg2[%c0_1, %c0_2] : memref<1x192xf32, #tpu.memory_space<vmem>>, vector<1x192xf32>
    %2 = arith.mulf %0, %1 : vector<1x192xf32>
    %3 = math.tanh %2 : vector<1x192xf32>
    %c0_3 = arith.constant 0 : index
    %c0_4 = arith.constant 0 : index
    %4 = vector.load %arg3[%c0_3, %c0_4] : memref<1x576xf32, #tpu.memory_space<vmem>>, vector<1x576xf32>
    %c0_5 = arith.constant 0 : index
    %c0_6 = arith.constant 0 : index
    %5 = vector.load %arg4[%c0_5, %c0_6] : memref<1x576xf32, #tpu.memory_space<vmem>>, vector<1x576xf32>
    %6 = arith.mulf %4, %5 : vector<1x576xf32>
    %7 = math.tanh %6 : vector<1x576xf32>
    %c0_7 = arith.constant 0 : index
    %c0_8 = arith.constant 0 : index
    %8 = vector.load %arg0[%c0_7, %c0_8] : memref<2x192xf32, #tpu.memory_space<vmem>>, vector<2x192xf32>
    %9 = vector.broadcast %3 : vector<1x192xf32> to vector<2x192xf32>
    %10 = arith.addf %8, %9 : vector<2x192xf32>
    %c0_9 = arith.constant 0 : index
    %c0_10 = arith.constant 0 : index
    %11 = vector.load %arg5[%c0_9, %c0_10] : memref<192x128xbf16, #tpu.memory_space<vmem>>, vector<192x128xbf16>
    %12 = arith.extf %11 : vector<192x128xbf16> to vector<192x128xf32>
    %c0_11 = arith.constant 0 : index
    %c0_12 = arith.constant 0 : index
    %13 = vector.load %arg6[%c0_11, %c0_12] : memref<576x128xbf16, #tpu.memory_space<vmem>>, vector<576x128xbf16>
    %14 = arith.extf %13 : vector<576x128xbf16> to vector<576x128xf32>
    %cst = arith.constant dense<0.000000e+00> : vector<2x128xf32>
    %15 = tpu.matmul %10, %12, %cst {dimension_numbers = #tpu.dot_dimension_numbers<[1], [0], [0], [1], [0, 0, 1, 1], [], []>, precision = #tpu.contract_precision<fp32>} : vector<2x192xf32>, vector<192x128xf32>, vector<2x128xf32> -> vector<2x128xf32>
    %cst_13 = arith.constant dense<0.000000e+00> : vector<1x128xf32>
    %16 = tpu.matmul %7, %14, %cst_13 {dimension_numbers = #tpu.dot_dimension_numbers<[1], [0], [0], [1], [0, 0, 1, 1], [], []>, precision = #tpu.contract_precision<fp32>} : vector<1x576xf32>, vector<576x128xf32>, vector<1x128xf32> -> vector<1x128xf32>
    %17 = vector.broadcast %16 : vector<1x128xf32> to vector<2x128xf32>
    %18 = arith.addf %15, %17 : vector<2x128xf32>
    %c0_14 = arith.constant 0 : index
    %c0_15 = arith.constant 0 : index
    %19 = vector.load %arg7[%c0_14, %c0_15] : memref<1x128xf32, #tpu.memory_space<vmem>>, vector<1x128xf32>
    %20 = vector.broadcast %19 : vector<1x128xf32> to vector<2x128xf32>
    %21 = arith.addf %18, %20 : vector<2x128xf32>
    %cst_16 = arith.constant dense<0xFF800000> : vector<2xf32>
    %22 = vector.multi_reduction <maximumf>, %21, %cst_16 [1] : vector<2x128xf32> to vector<2xf32>
    %23 = vector.shape_cast %22 : vector<2xf32> to vector<2x1xf32>
    %24 = vector.broadcast %23 : vector<2x1xf32> to vector<2x128xf32>
    %25 = arith.subf %21, %24 : vector<2x128xf32>
    %26 = math.exp %25 : vector<2x128xf32>
    %cst_17 = arith.constant dense<0.000000e+00> : vector<2xf32>
    %27 = vector.multi_reduction <add>, %26, %cst_17 [1] : vector<2x128xf32> to vector<2xf32>
    %28 = vector.shape_cast %27 : vector<2xf32> to vector<2x1xf32>
    %29 = vector.broadcast %28 : vector<2x1xf32> to vector<2x128xf32>
    %30 = arith.divf %26, %29 : vector<2x128xf32>
    %c0_18 = arith.constant 0 : index
    %c0_19 = arith.constant 0 : index
    %31 = vector.load %arg8[%c0_18, %c0_19] : memref<2x128xf32, #tpu.memory_space<vmem>>, vector<2x128xf32>
    tpu.vector_store %arg8[%c0_18, %c0_19], %30 {strides = array<i32>} : memref<2x128xf32, #tpu.memory_space<vmem>>, vector<2x128xf32>,
    return
  }
}

</mosaic_0001>

<bundles_post_ra>
// kernel: generic_program_forward.1
= control target key start
LH: loop header
LB: loop body
LE: loop exit
PB: predicated region body
PF: predicated region fallthrough
CT: control target
= control target key end

     0   :  { %s4031_s0 = inlined_call_operand.vmem [shape: f32[2,192], index: 0, kind: input, shape index: {}]   ;;  %s4032_s1 = inlined_call_operand.vmem [shape: f32[1,192], index: 1, kind: input, shape index: {}]   ;;  %s4033_s2 = inlined_call_operand.vmem [shape: f32[1,192], index: 2, kind: input, shape index: {}]   ;;  %s4034_s3 = inlined_call_operand.vmem [shape: f32[1,576], index: 3, kind: input, shape index: {}]   ;;  %s4035_s4 = inlined_call_operand.vmem [shape: f32[1,576], index: 4, kind: input, shape index: {}]   ;;  %s4036_s5 = inlined_call_operand.vmem [shape: bf16[192,128], index: 5, kind: input, shape index: {}]   ;;  %s4037_s6 = inlined_call_operand.vmem [shape: bf16[576,128], index: 6, kind: input, shape index: {}]   ;;  %s4038_s7 = inlined_call_operand.vmem [shape: f32[1,128], index: 7, kind: input, shape index: {}]   ;;  %s4039_s8 = inlined_call_operand.hbm [shape: f32[2,128], index: 8, kind: output, shape index: {}]  }
   0x1   :  { %v2118_v0 = vld [vmem:[%s4037_s6 + $0x38] sm:$0xff]   ;;  %v2117_v1 = vld [vmem:[%s4037_s6 + $0x30] sm:$0xff]   ;;  %v2116_v2 = vld [vmem:[%s4037_s6 + $0x28] sm:$0xff]  }
   0x2   :  { %v2238_v3 = vunpack.c.h.bf16 %v2118_v0  ;;  %v2240_v4 = vunpack.c.l.bf16 %v2118_v0  ;;  %v2242_v5 = vunpack.c.h.bf16 %v2117_v1  ;;  %v2244_v6 = vunpack.c.l.bf16 %v2117_v1  ;;  %v2115_v7 = vld [vmem:[%s4037_s6 + $0x20] sm:$0xff]   ;;  %v2114_v14 = vld [vmem:[%s4037_s6 + $0x18] sm:$0xff]  }
   0x3   :  { %v2249_v8 = vunpack.c.h.bf16 %v2116_v2  ;;  %v2251_v9 = vunpack.c.l.bf16 %v2116_v2  ;;  %v2253_v10 = vunpack.c.h.bf16 %v2115_v7 }
   0x4   :  { %252 = vmatpush.msra.mxu0 %v2238_v3  ;;  %v2258_v11 = vsub.f32 %v2238_v3, %v2238_v3  ;;  %v2262_v12 = vsub.f32 %v2240_v4, %v2240_v4  ;;  %400 = vmatpush.msra.mxu3 %v2238_v3  ;;  %v2267_v13 = vsub.f32 %v2242_v5, %v2242_v5 }
   0x5   :  { %13 = vsyncpa [#allocation3], 0  ;;  %v2274_v15 = vsub.f32 %v2244_v6, %v2244_v6  ;;  %v2278_v16 = vsub.f32 %v2249_v8, %v2249_v8  ;;  %v2280_v17 = vunpack.c.l.bf16 %v2115_v7  ;;  %v2289_v21 = vsub.f32 %v2251_v9, %v2251_v9  ;;  %v2113_v29 = vld [vmem:[%s4037_s6 + $0x10] sm:$0xff]   ;;  %v2112_v42 = vld [vmem:[%s4037_s6 + $0x8] sm:$0xff]   ;;  %s1900_s13 = sshll.u32 %s4039_s8, 4  ;;  %s1901_s13 = int_to_ptr.hbm [resolvable:$true] %s1900_s13 }
   0x6   :  { %253 = vmatpush.msra.mxu0 %v2240_v4  ;;  %363 = vmatpush.msra.mxu2 %v2258_v11  ;;  %v278_v18 = vand.u32 4294901760, %v2258_v11  ;;  %v283_v19 = vand.u32 4294901760, %v2262_v12  ;;  %v4055_v20 = vand.u32 4294901760, %v2267_v13  ;;  %v2295_v23 = vsub.f32 %v2253_v10, %v2253_v10  ;;  %v2126_v52 = vld [vmem:[%s4037_s6 + $0x78] sm:$0xff]   ;;  %v1958_v54 = vld [vmem:[%s4037_s6] sm:$0xff]   ;;  %v2125_v7 = vld [vmem:[%s4037_s6 + $0x70] sm:$0xff]  }
   0x7   :  { %401 = vmatpush.msra.mxu3 %v2240_v4  ;;  %v4054_v22 = vand.u32 4294901760, %v2274_v15  ;;  %v2297_v24 = vunpack.c.h.bf16 %v2114_v14  ;;  %v4052_v28 = vand.u32 4294901760, %v2278_v16  ;;  %v2317_v30 = vsub.f32 %v2280_v17, %v2280_v17 }
   0x8   :  { %254 = vmatpush.msra.mxu0 %v2242_v5  ;;  %365 = vmatpush.msra.mxu2 %v2262_v12  ;;  %v279_v25 = vsub.f32 %v2258_v11, %v278_v18  ;;  %v284_v26 = vsub.f32 %v2262_v12, %v283_v19  ;;  %v289_v27 = vsub.f32 %v2267_v13, %v4055_v20  ;;  %v2319_v31 = vunpack.c.l.bf16 %v2114_v14 }
   0x9   :  { %402 = vmatpush.msra.mxu3 %v2242_v5  ;;  %v294_v34 = vsub.f32 %v2274_v15, %v4054_v22  ;;  %v4050_v35 = vand.u32 4294901760, %v2289_v21  ;;  %v2328_v36 = vunpack.c.h.bf16 %v2113_v29  ;;  %v299_v38 = vsub.f32 %v2278_v16, %v4052_v28  ;;  %v34_v28 = vld [vmem:[%s4034_s3] sm:$0x1f] }
   0xa   :  { %255 = vmatpush.msra.mxu0 %v2244_v6  ;;  %367 = vmatpush.msra.mxu2 %v2267_v13  ;;  %v280_v32 = vand.u32 4294901760, %v279_v25  ;;  %v285_v33 = vand.u32 4294901760, %v284_v26  ;;  %v290_v37 = vand.u32 4294901760, %v289_v27  ;;  %v2336_v39 = vsub.f32 %v2297_v24, %v2297_v24 }
   0xb   :  { %403 = vmatpush.msra.mxu3 %v2244_v6  ;;  %v4049_v40 = vand.u32 4294901760, %v2295_v23  ;;  %v2343_v41 = vsub.f32 %v2319_v31, %v2319_v31  ;;  %v295_v43 = vand.u32 4294901760, %v294_v34  ;;  %v304_v44 = vsub.f32 %v2289_v21, %v4050_v35 }
   0xc   :  { %256 = vmatpush.msra.mxu0 %v2249_v8  ;;  %281 = vmatpush.msra.mxu1 %v280_v32  ;;  %v2352_v45 = vunpack.c.l.bf16 %v2113_v29  ;;  %v4046_v46 = vand.u32 4294901760, %v2317_v30  ;;  %v2359_v47 = vsub.f32 %v2328_v36, %v2328_v36  ;;  %v300_v48 = vand.u32 4294901760, %v299_v38 }
   0xd   :  { %369 = vmatpush.msra.mxu2 %v2274_v15  ;;  %404 = vmatpush.msra.mxu3 %v2249_v8  ;;  %v309_v49 = vsub.f32 %v2295_v23, %v4049_v40  ;;  %v2365_v50 = vunpack.c.h.bf16 %v2112_v42  ;;  %v4045_v51 = vand.u32 4294901760, %v2336_v39  ;;  %v4043_v53 = vand.u32 4294901760, %v2343_v41 }
   0xe   :  { %257 = vmatpush.msra.mxu0 %v2251_v9  ;;  %286 = vmatpush.msra.mxu1 %v285_v33  ;;  %v305_v55 = vand.u32 4294901760, %v304_v44  ;;  %v314_v56 = vsub.f32 %v2317_v30, %v4046_v46  ;;  %v2383_v57 = vsub.f32 %v2352_v45, %v2352_v45  ;;  %v2385_v58 = vunpack.c.l.bf16 %v2112_v42  ;;  %v2124_v44 = vld [vmem:[%s4037_s6 + $0x68] sm:$0xff]  }
   0xf   :  { %371 = vmatpush.msra.mxu2 %v2278_v16  ;;  %405 = vmatpush.msra.mxu3 %v2251_v9  ;;  %v4042_v59 = vand.u32 4294901760, %v2359_v47  ;;  %v2390_v60 = vunpack.c.h.bf16 %v2126_v52  ;;  %v310_v61 = vand.u32 4294901760, %v309_v49  ;;  %v319_v62 = vsub.f32 %v2336_v39, %v4045_v51 }
  0x10   :  { %258 = vmatpush.msra.mxu0 %v2253_v10  ;;  %291 = vmatpush.msra.mxu1 %v290_v37  ;;  %v2398_v63 = vsub.f32 %v2365_v50, %v2365_v50  ;;  %v2400_v0 = vunpack.c.h.bf16 %v1958_v54  ;;  %v324_v1 = vsub.f32 %v2343_v41, %v4043_v53  ;;  %v2407_v2 = vunpack.c.l.bf16 %v2126_v52 }
  0x11   :  { %373 = vmatpush.msra.mxu2 %v2289_v21  ;;  %406 = vmatpush.msra.mxu3 %v2253_v10  ;;  %v315_v14 = vand.u32 4294901760, %v314_v56  ;;  %v2415_v25 = vsub.f32 %v2385_v58, %v2385_v58  ;;  %v2417_v26 = vunpack.c.l.bf16 %v1958_v54  ;;  %v4041_v27 = vand.u32 4294901760, %v2383_v57 }
  0x12   :  { %259 = vmatpush.msra.mxu0 %v2280_v17  ;;  %296 = vmatpush.msra.mxu1 %v295_v43  ;;  %v329_v29 = vsub.f32 %v2359_v47, %v4042_v59  ;;  %v2427_v32 = vsub.f32 %v2390_v60, %v2390_v60  ;;  %v320_v33 = vand.u32 4294901760, %v319_v62  ;;  %v2432_v34 = vsub.f32 %v2400_v0, %v2400_v0 }
  0x13   :  { %375 = vmatpush.msra.mxu2 %v2295_v23  ;;  %407 = vmatpush.msra.mxu3 %v2280_v17  ;;  %v4040_v37 = vand.u32 4294901760, %v2398_v63  ;;  %v2435_v38 = vunpack.c.h.bf16 %v2125_v7  ;;  %v325_v42 = vand.u32 4294901760, %v324_v1  ;;  %v2441_v43 = vsub.f32 %v2407_v2, %v2407_v2 }
  0x14   :  { %260 = vmatpush.msra.mxu0 %v2297_v24  ;;  %301 = vmatpush.msra.mxu1 %v300_v48  ;;  %v334_v48 = vsub.f32 %v2383_v57, %v4041_v27  ;;  %v2452_v49 = vsub.f32 %v2417_v26, %v2417_v26  ;;  %v4044_v52 = vand.u32 4294901760, %v2415_v25  ;;  %v2455_v54 = vunpack.c.l.bf16 %v2125_v7 }
  0x15   :  { %377 = vmatpush.msra.mxu2 %v2317_v30  ;;  %408 = vmatpush.msra.mxu3 %v2297_v24  ;;  %v4047_v56 = vand.u32 4294901760, %v2427_v32  ;;  %v4048_v62 = vand.u32 4294901760, %v2432_v34  ;;  %v2467_v1 = vsub.f32 %v2435_v38, %v2435_v38  ;;  %v2469_v7 = vunpack.c.h.bf16 %v2124_v44 }
  0x16   :  { %261 = vmatpush.msra.mxu0 %v2319_v31  ;;  %306 = vmatpush.msra.mxu1 %v305_v55  ;;  %v330_v55 = vand.u32 4294901760, %v329_v29  ;;  %v4051_v29 = vand.u32 4294901760, %v2441_v43  ;;  %v344_v27 = vsub.f32 %v2415_v25, %v4044_v52  ;;  %v4053_v59 = vand.u32 4294901760, %v2452_v49 }
  0x17   :  { %379 = vmatpush.msra.mxu2 %v2336_v39  ;;  %409 = vmatpush.msra.mxu3 %v2319_v31  ;;  %v2486_v53 = vsub.f32 %v2455_v54, %v2455_v54  ;;  %v349_v52 = vsub.f32 %v2432_v34, %v4048_v62  ;;  %v4056_v51 = vand.u32 4294901760, %v2467_v1  ;;  %v2502_v46 = vsub.f32 %v2469_v7, %v2469_v7  ;;  %v2122_v62 = vld [vmem:[%s4037_s6 + $0x58] sm:$0xff]  }
  0x18   :  { %262 = vmatpush.msra.mxu0 %v2328_v36  ;;  %311 = vmatpush.msra.mxu1 %v310_v61  ;;  %v339_v61 = vsub.f32 %v2398_v63, %v4040_v37  ;;  %v335_v37 = vand.u32 4294901760, %v334_v48  ;;  %v345_v40 = vand.u32 4294901760, %v344_v27  ;;  %v354_v35 = vsub.f32 %v2452_v49, %v4053_v59 }
  0x19   :  { %381 = vmatpush.msra.mxu2 %v2343_v41  ;;  %410 = vmatpush.msra.mxu3 %v2328_v36  ;;  %v350_v59 = vand.u32 4294901760, %v349_v52  ;;  %v534_v22 = vsub.f32 %v2467_v1, %v4056_v51  ;;  %v2121_v52 = vld [vmem:[%s4037_s6 + $0x50] sm:$0xff]   ;;  %v4084_v20 = vand.u32 4294901760, %v2486_v53  ;;  %vm249_vm0 = vcmask 523264  }
  0x1a   :  { %263 = vmatpush.msra.mxu0 %v2352_v45  ;;  %316 = vmatpush.msra.mxu1 %v315_v14  ;;  %v2123_v14 = vld [vmem:[%s4037_s6 + $0x60] sm:$0xff]   ;;  %v340_v48 = vand.u32 4294901760, %v339_v61  ;;  %v355_v51 = vand.u32 4294901760, %v354_v35  ;;  %vm43_vm1 = vcmask 1041408  }
  0x1b   :  { %383 = vmatpush.msra.mxu2 %v2359_v47  ;;  %411 = vmatpush.msra.mxu3 %v2352_v45  ;;  %v2513_v61 = vunpack.c.l.bf16 %v2123_v14  ;;  %v539_v12 = vsub.f32 %v2486_v53, %v4084_v20 }
  0x1c   :  { %264 = vmatpush.msra.mxu0 %v2365_v50  ;;  %321 = vmatpush.msra.mxu1 %v320_v33  ;;  %v2477_v33 = vunpack.c.l.bf16 %v2124_v44  ;;  %v524_v44 = vsub.f32 %v2427_v32, %v4047_v56  ;;  %v529_v56 = vsub.f32 %v2441_v43, %v4051_v29  ;;  %v2541_v29 = vunpack.c.h.bf16 %v2122_v62 }
  0x1d   :  { %385 = vmatpush.msra.mxu2 %v2383_v57  ;;  %412 = vmatpush.msra.mxu3 %v2365_v50 }
  0x1e   :  { %265 = vmatpush.msra.mxu0 %v2385_v58  ;;  %326 = vmatpush.msra.mxu1 %v325_v42  ;;  %v2493_v42 = vunpack.c.h.bf16 %v2123_v14  ;;  %v35_v14 = vld [vmem:[%s4035_s4] sm:$0x1f]  ;;  %v525_v27 = vand.u32 4294901760, %v524_v44  ;;  %v530_v11 = vand.u32 4294901760, %v529_v56  ;;  %v2549_v44 = vsub.f32 %v2513_v61, %v2513_v61 }
  0x1f   :  { %387 = vmatpush.msra.mxu2 %v2398_v63  ;;  %413 = vmatpush.msra.mxu3 %v2385_v58  ;;  %v4085_v56 = vand.u32 4294901760, %v2267_v13  ;;  %v2569_v20 = vsub.f32 %v2541_v29, %v2541_v29  ;;  %v4087_v13 = vand.u32 4294901760, %v2274_v15  ;;  %v2587_v15 = vunpack.c.l.bf16 %v2121_v52 }
  0x20   :  { %266 = vmatpush.msra.mxu0 %v2400_v0  ;;  %331 = vmatpush.msra.mxu1 %v330_v55  ;;  %v2511_v55 = vsub.f32 %v2477_v33, %v2477_v33 }
  0x21   :  { %389 = vmatpush.msra.mxu2 %v2415_v25  ;;  %414 = vmatpush.msra.mxu3 %v2400_v0 }
  0x22   :  { %267 = vmatpush.msra.mxu0 %v2417_v26  ;;  %336 = vmatpush.msra.mxu1 %v335_v37  ;;  %v2534_v37 = vsub.f32 %v2493_v42, %v2493_v42 }
  0x23   :  { %391 = vmatpush.msra.mxu2 %v2432_v34  ;;  %415 = vmatpush.msra.mxu3 %v2417_v26 }
  0x24   :  { %425 = vmatpush.msrb.mxu0 %v278_v18  ;;  %341 = vmatpush.msra.mxu1 %v340_v48  ;;  %v36_v48 = vmul.f32 %v35_v14, %v34_v28  ;;  %v4057_v18 = vand.u32 4294901760, %v2534_v37  ;;  %v535_v28 = vand.u32 4294901760, %v534_v22  ;;  %v4088_v14 = vand.u32 4294901760, %v2511_v55 }
  0x25   :  { %393 = vmatpush.msra.mxu2 %v2452_v49  ;;  %526 = vmatpush.msrb.mxu3 %v525_v27  ;;  %v4058_v22 = vand.u32 4294901760, %v2549_v44 }
  0x26   :  { %428 = vmatpush.msrb.mxu0 %v283_v19  ;;  %346 = vmatpush.msra.mxu1 %v345_v40  ;;  %v2558_v19 = vunpack.c.l.bf16 %v2122_v62  ;;  %2149 = vtanh.f32 %v36_v48  ;;  %v4086_v40 = vand.u32 4294901760, %v2502_v46  ;;  %v2571_v62 = vunpack.c.h.bf16 %v2121_v52 }
  0x27   :  { %497 = vmatpush.msrb.mxu2 %v2390_v60  ;;  %531 = vmatpush.msrb.mxu3 %v530_v11  ;;  %v549_v27 = vsub.f32 %v2511_v55, %v4088_v14  ;;  %v540_v48 = vand.u32 4294901760, %v539_v12  ;;  %v4089_v11 = vand.u32 4294901760, %v2278_v16  ;;  %v4059_v12 = vand.u32 4294901760, %v2569_v20 }
  0x28   :  { %431 = vmatpush.msrb.mxu0 %v4085_v56  ;;  %351 = vmatpush.msra.mxu1 %v350_v59  ;;  %v544_v35 = vsub.f32 %v2502_v46, %v4086_v40  ;;  %v2120_v59 = vld [vmem:[%s4037_s6 + $0x48] sm:$0xff]   ;;  %v2585_v56 = vsub.f32 %v2558_v19, %v2558_v19  ;;  %v554_v40 = vsub.f32 %v2534_v37, %v4057_v18 }
  0x29   :  { %498 = vmatpush.msrb.mxu2 %v2407_v2  ;;  %536 = vmatpush.msrb.mxu3 %v535_v28  ;;  %v2601_v52 = vunpack.c.h.bf16 %v2120_v59  ;;  %v550_v14 = vand.u32 4294901760, %v549_v27  ;;  %v559_v28 = vsub.f32 %v2549_v44, %v4058_v22  ;;  %v2617_v18 = vunpack.c.l.bf16 %v2120_v59 }
  0x2a   :  { %434 = vmatpush.msrb.mxu0 %v4087_v13  ;;  %356 = vmatpush.msra.mxu1 %v355_v51  ;;  %v545_v51 = vand.u32 4294901760, %v544_v35  ;;  %v2599_v13 = vsub.f32 %v2571_v62, %v2571_v62  ;;  %v4091_v27 = vand.u32 4294901760, %v2295_v23  ;;  %v564_v59 = vsub.f32 %v2569_v20, %v4059_v12 }
  0x2b   :  { %499 = vmatpush.msrb.mxu2 %v2435_v38  ;;  %541 = vmatpush.msrb.mxu3 %v540_v48  ;;  %v555_v48 = vand.u32 4294901760, %v554_v40  ;;  %v2633_v22 = vsub.f32 %v2601_v52, %v2601_v52  ;;  %v4092_v23 = vand.u32 4294901760, %v2317_v30  ;;  %v560_v40 = vand.u32 4294901760, %v559_v28 }
  0x2c   :  { %437 = vmatpush.msrb.mxu0 %v4089_v11  ;;  %476 = vmatpush.msrb.mxu1 %v2238_v3  ;;  %v2603_v16 = vpop.eup %2149  ;;  %v4090_v3 = vand.u32 4294901760, %v2289_v21  ;;  %v2615_v11 = vsub.f32 %v2587_v15, %v2587_v15  ;;  %v4094_v30 = vand.u32 4294901760, %v2336_v39  ;;  %v565_v28 = vand.u32 4294901760, %v564_v59 }
  0x2d   :  { %500 = vmatpush.msrb.mxu2 %v2455_v54  ;;  %v240_v21 = vperm.slane %v2603_v16, 0  ;;  %546 = vmatpush.msrb.mxu3 %v545_v51  ;;  %v4093_v51 = vand.u32 4294901760, %v2585_v56  ;;  %v583_v12 = vand.u32 4294901760, %v2633_v22  ;;  %v4096_v39 = vand.u32 4294901760, %v2343_v41 }
  0x2e   :  { %440 = vmatpush.msrb.mxu0 %v4090_v3  ;;  %477 = vmatpush.msrb.mxu1 %v2240_v4  ;;  %v2119_v4 = vld [vmem:[%s4037_s6 + $0x40] sm:$0xff]   ;;  %v2649_v3 = vsub.f32 %v2617_v18, %v2617_v18 }
  0x2f   :  { %501 = vmatpush.msrb.mxu2 %v2469_v7  ;;  %v2635_v35 = vand.u32 4294901760, %v240_v21  ;;  %551 = vmatpush.msrb.mxu3 %v550_v14  ;;  %v2657_v14 = vunpack.c.l.bf16 %v2119_v4 }
  0x30   :  { %443 = vmatpush.msrb.mxu0 %v4091_v27  ;;  %478 = vmatpush.msrb.mxu1 %v2242_v5  ;;  %v2640_v5 = vunpack.c.h.bf16 %v2119_v4  ;;  %v569_v27 = vsub.f32 %v2585_v56, %v4093_v51  ;;  %v588_v59 = vand.u32 4294901760, %v2649_v3 }
  0x31   :  { %502 = vmatpush.msrb.mxu2 %v2477_v33  ;;  %556 = vmatpush.msrb.mxu3 %v555_v48  ;;  %v2682_v41 = vsub.f32 %v2657_v14, %v2657_v14 }
  0x32   :  { %446 = vmatpush.msrb.mxu0 %v4092_v23  ;;  %479 = vmatpush.msrb.mxu1 %v2244_v6  ;;  %v2655_v6 = vsub.f32 %v240_v21, %v2635_v35  ;;  %v4095_v23 = vand.u32 4294901760, %v2599_v13  ;;  %v570_v4 = vand.u32 4294901760, %v569_v27  ;;  %v4097_v21 = vand.u32 4294901760, %v2615_v11 }
  0x33   :  { %503 = vmatpush.msrb.mxu2 %v2493_v42  ;;  %561 = vmatpush.msrb.mxu3 %v560_v40  ;;  %v241_v40 = vperm.slane %v2603_v16, 1 }
  0x34   :  { %449 = vmatpush.msrb.mxu0 %v4094_v30  ;;  %480 = vmatpush.msrb.mxu1 %v2249_v8  ;;  %v574_v51 = vsub.f32 %v2599_v13, %v4095_v23  ;;  %v2669_v8 = vsub.f32 %v2640_v5, %v2640_v5  ;;  %v579_v48 = vsub.f32 %v2615_v11, %v4097_v21  ;;  %v4098_v30 = vand.u32 4294901760, %v2359_v47 }
  0x35   :  { %504 = vmatpush.msrb.mxu2 %v2513_v61  ;;  %566 = vmatpush.msrb.mxu3 %v565_v28  ;;  %v584_v23 = vsub.f32 %v2633_v22, %v583_v12  ;;  %v4099_v47 = vand.u32 4294901760, %v2383_v57  ;;  %v589_v28 = vsub.f32 %v2649_v3, %v588_v59  ;;  %v598_v21 = vand.u32 4294901760, %v2682_v41 }
  0x36   :  { %452 = vmatpush.msrb.mxu0 %v4096_v39  ;;  %481 = vmatpush.msrb.mxu1 %v2251_v9  ;;  %v270_v9 = vand.u32 4294901760, %v2655_v6  ;;  %v575_v27 = vand.u32 4294901760, %v574_v51  ;;  %v580_v39 = vand.u32 4294901760, %v579_v48  ;;  %v4100_v51 = vand.u32 4294901760, %v2398_v63 }
  0x37   :  { %505 = vmatpush.msrb.mxu2 %v2541_v29  ;;  %571 = vmatpush.msrb.mxu3 %v570_v4  ;;  %v585_v4 = vand.u32 4294901760, %v584_v23  ;;  %v4101_v48 = vand.u32 4294901760, %v2415_v25  ;;  %v599_v25 = vsub.f32 %v2682_v41, %v598_v21  ;;  %v4103_v23 = vand.u32 4294901760, %v2452_v49 }
  0x38   :  { %455 = vmatpush.msrb.mxu0 %v4098_v30  ;;  %482 = vmatpush.msrb.mxu1 %v2253_v10  ;;  %v593_v10 = vand.u32 4294901760, %v2669_v8  ;;  %v271_v57 = vsub.f32 %v2655_v6, %v270_v9  ;;  %v4102_v30 = vand.u32 4294901760, %v2432_v34  ;;  %v4105_v49 = vand.u32 4294901760, %v2441_v43 }
  0x39   :  { %506 = vmatpush.msrb.mxu2 %v2558_v19  ;;  %576 = vmatpush.msrb.mxu3 %v575_v27 }
  0x3a   :  { %458 = vmatpush.msrb.mxu0 %v4099_v47  ;;  %483 = vmatpush.msrb.mxu1 %v2280_v17  ;;  %v2702_v17 = vand.u32 4294901760, %v241_v40  ;;  %v594_v63 = vsub.f32 %v2669_v8, %v593_v10  ;;  %v272_v27 = vand.u32 4294901760, %v271_v57 }
  0x3b   :  { %507 = vmatpush.msrb.mxu2 %v2571_v62  ;;  %581 = vmatpush.msrb.mxu3 %v580_v39 }
  0x3c   :  { %461 = vmatpush.msrb.mxu0 %v4100_v51  ;;  %484 = vmatpush.msrb.mxu1 %v2297_v24  ;;  %v590_v24 = vand.u32 4294901760, %v589_v28  ;;  %v595_v34 = vand.u32 4294901760, %v594_v63  ;;  %v2129_v28 = vld [vmem:[%s4037_s6 + $0x90] sm:$0xff]  }
  0x3d   :  { %508 = vmatpush.msrb.mxu2 %v2587_v15  ;;  %586 = vmatpush.msrb.mxu3 %v585_v4  ;;  %v242_v4 = vperm.slane %v2603_v16, 2 }
  0x3e   :  { %464 = vmatpush.msrb.mxu0 %v4101_v48  ;;  %485 = vmatpush.msrb.mxu1 %v2319_v31  ;;  %v2719_v31 = vsub.f32 %v241_v40, %v2702_v17 }
  0x3f   :  { %509 = vmatpush.msrb.mxu2 %v2601_v52  ;;  %591 = vmatpush.msrb.mxu3 %v590_v24  ;;  %v2933_v24 = vunpack.c.h.bf16 %v2129_v28 }
  0x40   :  { %467 = vmatpush.msrb.mxu0 %v4102_v30  ;;  %486 = vmatpush.msrb.mxu1 %v2328_v36  ;;  %v600_v36 = vand.u32 4294901760, %v599_v25  ;;  %v515_v47 = vand.u32 4294901760, %v2719_v31  ;;  %v2128_v25 = vld [vmem:[%s4037_s6 + $0x88] sm:$0xff]  }
  0x41   :  { %510 = vmatpush.msrb.mxu2 %v2617_v18  ;;  %273 = vmatmul.f32.vlgmr.msra.gmra.mxu0 %v272_v27 }
  0x42   :  { %470 = vmatpush.msrb.mxu0 %v4103_v23  ;;  %487 = vmatpush.msrb.mxu1 %v2352_v45  ;;  %v4104_v45 = vand.u32 4294901760, %v2427_v32 }
  0x43   :  { %511 = vmatpush.msrb.mxu2 %v2640_v5  ;;  %596 = vmatpush.msrb.mxu3 %v595_v34  ;;  %v2949_v34 = vunpack.c.l.bf16 %v2129_v28 }
  0x44   :  { %488 = vmatpush.msrb.mxu1 %v2365_v50  ;;  %608 = vmatpush.msra.mxu0 %v2427_v32  ;;  %v516_v50 = vsub.f32 %v2719_v31, %v515_v47 }
  0x45   :  { %512 = vmatpush.msrb.mxu2 %v2657_v14  ;;  %601 = vmatpush.msrb.mxu3 %v600_v36 }
  0x46   :  { %396 = vmatmul.f32.vlgmr.msra.gmra.mxu2 %v2655_v6  ;;  %610 = vmatpush.msra.mxu0 %v2441_v43  ;;  %v517_v32 = vand.u32 4294901760, %v516_v50  ;;  %v4107_v43 = vand.u32 4294901760, %v2486_v53 }
  0x47   :  { %670 = vmatpush.msra.mxu2 %v4104_v45  ;;  %489 = vmatpush.msrb.mxu1 %v2385_v58  ;;  %v4106_v58 = vand.u32 4294901760, %v2467_v1  ;;  %v2954_v45 = vand.u32 4294901760, %v242_v4 }
  0x48   :  { %419 = vmatmul.f32.vlgmr.msra.gmra.mxu3 %v270_v9  ;;  %612 = vmatpush.msra.mxu0 %v2467_v1 }
  0x49   :  { %673 = vmatpush.msra.mxu2 %v4105_v49  ;;  %721 = vmatpush.msra.mxu3 %v2390_v60  ;;  %v2962_v49 = vsub.f32 %v2933_v24, %v2933_v24 }
  0x4a   :  { %490 = vmatpush.msrb.mxu1 %v2400_v0  ;;  %614 = vmatpush.msra.mxu0 %v2486_v53  ;;  %v4108_v0 = vand.u32 4294901760, %v2502_v46  ;;  %v4109_v53 = vand.u32 4294901760, %v2511_v55 }
  0x4b   :  { %358 = vmatmul.f32.vlgmr.msra.gmra.mxu1 %v2635_v35  ;;  %676 = vmatpush.msra.mxu2 %v4106_v58  ;;  %v2964_v58 = vunpack.c.h.bf16 %v2128_v25 }
  0x4c   :  { %722 = vmatpush.msra.mxu3 %v2407_v2  ;;  %491 = vmatpush.msrb.mxu1 %v2417_v26  ;;  %v2134_v26 = vld [vmem:[%s4037_s6 + $0xb8] sm:$0xff]  }
  0x4d   :  { %616 = vmatpush.msra.mxu0 %v2502_v46  ;;  %679 = vmatpush.msra.mxu2 %v4107_v43  ;;  %v4110_v46 = vand.u32 4294901760, %v2534_v37  ;;  %v2795_v1 = vunpack.c.h.bf16 %v2134_v26 }
  0x4e   :  { %645 = vmatpush.msra.mxu1 %v2390_v60  ;;  %723 = vmatpush.msra.mxu3 %v2435_v38  ;;  %v4111_v60 = vand.u32 4294901760, %v2549_v44 }
  0x4f   :  { %518 = vmatmul.f32.vlgmr.msrb.gmra.mxu2 %v517_v32  ;;  %618 = vmatpush.msra.mxu0 %v2511_v55 }
  0x50   :  { %646 = vmatpush.msra.mxu1 %v2407_v2  ;;  %682 = vmatpush.msra.mxu2 %v4108_v0  ;;  %v4112_v2 = vand.u32 4294901760, %v2569_v20 }
  0x51   :  { %724 = vmatpush.msra.mxu3 %v2455_v54  ;;  %472 = vmatmul.f32.vlgmr.msrb.gmra.mxu0 %v2635_v35 }
  0x52   :  { %603 = vmatmul.f32.vlgmr.msrb.gmra.mxu3 %v2702_v17  ;;  %620 = vmatpush.msra.mxu0 %v2534_v37 }
  0x53   :  { %647 = vmatpush.msra.mxu1 %v2435_v38  ;;  %685 = vmatpush.msra.mxu2 %v4109_v53  ;;  %v4113_v38 = vand.u32 4294901760, %v2585_v56  ;;  %v2975_v53 = vsub.f32 %v2949_v34, %v2949_v34 }
  0x54   :  { %725 = vmatpush.msra.mxu3 %v2469_v7  ;;  %493 = vmatmul.f32.vlgmr.msrb.gmra.mxu1 %v2635_v35 }
  0x55   :  { %622 = vmatpush.msra.mxu0 %v2549_v44  ;;  %648 = vmatpush.msra.mxu1 %v2455_v54  ;;  %v4114_v54 = vand.u32 4294901760, %v2599_v13 }
  0x56   :  { %688 = vmatpush.msra.mxu2 %v4110_v46  ;;  %726 = vmatpush.msra.mxu3 %v2477_v33  ;;  %v2977_v46 = vunpack.c.l.bf16 %v2128_v25 }
  0x57   :  { %624 = vmatpush.msra.mxu0 %v2569_v20  ;;  %649 = vmatpush.msra.mxu1 %v2469_v7  ;;  %v2133_v7 = vld [vmem:[%s4037_s6 + $0xb0] sm:$0xff]  }
  0x58   :  { %691 = vmatpush.msra.mxu2 %v4111_v60  ;;  %727 = vmatpush.msra.mxu3 %v2493_v42  ;;  %v2816_v55 = vunpack.c.h.bf16 %v2133_v7  ;;  %v2830_v44 = vunpack.c.l.bf16 %v2133_v7 }
  0x59   :  { %626 = vmatpush.msra.mxu0 %v2585_v56  ;;  %650 = vmatpush.msra.mxu1 %v2477_v33  ;;  %v4115_v33 = vand.u32 4294901760, %v2615_v11  ;;  %v2131_v56 = vld [vmem:[%s4037_s6 + $0xa0] sm:$0xff]  }
  0x5a   :  { %694 = vmatpush.msra.mxu2 %v4112_v2  ;;  %728 = vmatpush.msra.mxu3 %v2513_v61  ;;  %v2841_v20 = vsub.f32 %v2816_v55, %v2816_v55  ;;  %v2870_v35 = vunpack.c.h.bf16 %v2131_v56  ;;  %v2127_v2 = vld [vmem:[%s4037_s6 + $0x80] sm:$0xff]  }
  0x5b   :  { %628 = vmatpush.msra.mxu0 %v2599_v13  ;;  %651 = vmatpush.msra.mxu1 %v2493_v42  ;;  %v2805_v42 = vunpack.c.l.bf16 %v2134_v26  ;;  %v2142_v26 = vld [vmem:[%s4037_s6 + $0xf8] sm:$0xff]  }
  0x5c   :  { %697 = vmatpush.msra.mxu2 %v4113_v38  ;;  %729 = vmatpush.msra.mxu3 %v2541_v29  ;;  %v2989_v38 = vsub.f32 %v242_v4, %v2954_v45 }
  0x5d   :  { %630 = vmatpush.msra.mxu0 %v2615_v11  ;;  %652 = vmatpush.msra.mxu1 %v2513_v61  ;;  %v2132_v61 = vld [vmem:[%s4037_s6 + $0xa8] sm:$0xff]   ;;  %v2828_v37 = vsub.f32 %v2805_v42, %v2805_v42  ;;  %v4075_v11 = vand.u32 4294901760, %v2841_v20 }
  0x5e   :  { %700 = vmatpush.msra.mxu2 %v4114_v54  ;;  %730 = vmatpush.msra.mxu3 %v2558_v19  ;;  %v4073_v28 = vand.u32 4294901760, %v2989_v38 }
  0x5f   :  { %632 = vmatpush.msra.mxu0 %v2633_v22  ;;  %653 = vmatpush.msra.mxu1 %v2541_v29  ;;  %v2814_v29 = vsub.f32 %v2795_v1, %v2795_v1  ;;  %v2846_v22 = vunpack.c.l.bf16 %v2132_v61  ;;  %v779_v40 = vsub.f32 %v2841_v20, %v4075_v11 }
  0x60   :  { %703 = vmatpush.msra.mxu2 %v4115_v33  ;;  %731 = vmatpush.msra.mxu3 %v2571_v62  ;;  %v2997_v33 = vsub.f32 %v2964_v58, %v2964_v58 }
  0x61   :  { %634 = vmatpush.msra.mxu0 %v2649_v3  ;;  %654 = vmatpush.msra.mxu1 %v2558_v19  ;;  %v2834_v19 = vunpack.c.h.bf16 %v2132_v61  ;;  %v2877_v3 = vsub.f32 %v2846_v22, %v2846_v22  ;;  %v780_v48 = vand.u32 4294901760, %v779_v40  ;;  %v4061_v61 = vand.u32 4294901760, %v2962_v49 }
  0x62   :  { %706 = vmatpush.msra.mxu2 %v583_v12  ;;  %732 = vmatpush.msra.mxu3 %v2587_v15  ;;  %v773_v12 = vand.u32 4294901760, %v2828_v37  ;;  %v4060_v40 = vand.u32 4294901760, %v2975_v53 }
  0x63   :  { %636 = vmatpush.msra.mxu0 %v2669_v8  ;;  %655 = vmatpush.msra.mxu1 %v2571_v62  ;;  %v768_v62 = vand.u32 4294901760, %v2814_v29  ;;  %v2863_v13 = vsub.f32 %v2834_v19, %v2834_v19  ;;  %v2887_v8 = vunpack.c.l.bf16 %v2131_v56  ;;  %v3002_v56 = vunpack.c.h.bf16 %v2127_v2 }
  0x64   :  { %709 = vmatpush.msra.mxu2 %v588_v59  ;;  %733 = vmatpush.msra.mxu3 %v2601_v52  ;;  %v774_v6 = vsub.f32 %v2828_v37, %v773_v12  ;;  %v819_v4 = vsub.f32 %v2962_v49, %v4061_v61 }
  0x65   :  { %638 = vmatpush.msra.mxu0 %v2682_v41  ;;  %656 = vmatpush.msra.mxu1 %v2587_v15  ;;  %v2856_v15 = vsub.f32 %v2830_v44, %v2830_v44  ;;  %v4069_v9 = vand.u32 4294901760, %v2863_v13  ;;  %v3034_v25 = vsub.f32 %v3002_v56, %v3002_v56 }
  0x66   :  { %712 = vmatpush.msra.mxu2 %v593_v10  ;;  %734 = vmatpush.msra.mxu3 %v2617_v18  ;;  %v2900_v10 = vsub.f32 %v2870_v35, %v2870_v35  ;;  %v775_v51 = vand.u32 4294901760, %v774_v6 }
  0x67   :  { %641 = vmatmul.f32.vlgmr.msra.gmra.mxu0 %v2719_v31  ;;  %657 = vmatpush.msra.mxu1 %v2601_v52  ;;  %v769_v52 = vsub.f32 %v2814_v29, %v768_v62  ;;  %v4070_v59 = vand.u32 4294901760, %v2856_v15 }
  0x68   :  { %742 = vmatpush.msrb.mxu0 %v2795_v1  ;;  %715 = vmatpush.msra.mxu2 %v598_v21  ;;  %v2917_v21 = vsub.f32 %v2887_v8, %v2887_v8  ;;  %v4066_v30 = vand.u32 4294901760, %v2900_v10 }
  0x69   :  { %735 = vmatpush.msra.mxu3 %v2640_v5  ;;  %658 = vmatpush.msra.mxu1 %v2617_v18  ;;  %v2130_v18 = vld [vmem:[%s4037_s6 + $0x98] sm:$0xff]   ;;  %v770_v41 = vand.u32 4294901760, %v769_v52  ;;  %v784_v57 = vsub.f32 %v2856_v15, %v4070_v59  ;;  %v3004_v52 = vunpack.c.h.bf16 %v2142_v26 }
  0x6a   :  { %853 = vmatpush.msrb.mxu2 %v2814_v29  ;;  %743 = vmatpush.msrb.mxu0 %v2805_v42  ;;  %v2902_v39 = vunpack.c.h.bf16 %v2130_v18  ;;  %v4065_v36 = vand.u32 4294901760, %v2917_v21  ;;  %v799_v50 = vsub.f32 %v2900_v10, %v4066_v30 }
  0x6b   :  { %736 = vmatpush.msra.mxu3 %v2657_v14  ;;  %717 = vmatmul.f32.vlgmr.msra.gmra.mxu2 %v2702_v17  ;;  %v785_v31 = vand.u32 4294901760, %v784_v57  ;;  %v2141_v57 = vld [vmem:[%s4037_s6 + $0xf0] sm:$0xff]  }
  0x6c   :  { %744 = vmatpush.msrb.mxu0 %v2816_v55  ;;  %855 = vmatpush.msrb.mxu2 %v2828_v37  ;;  %v2931_v63 = vsub.f32 %v2902_v39, %v2902_v39  ;;  %v804_v0 = vsub.f32 %v2917_v21, %v4065_v36  ;;  %v800_v54 = vand.u32 4294901760, %v799_v50  ;;  %v824_v50 = vsub.f32 %v2975_v53, %v4060_v40  ;;  %v2137_v37 = vld [vmem:[%s4037_s6 + $0xd0] sm:$0xff]  }
  0x6d   :  { %890 = vmatpush.msrb.mxu3 %v2795_v1  ;;  %659 = vmatpush.msra.mxu1 %v2640_v5  ;;  %v4068_v5 = vand.u32 4294901760, %v2877_v3  ;;  %v3067_v40 = vunpack.c.l.bf16 %v2141_v57 }
  0x6e   :  { %738 = vmatmul.f32.vlgmr.msra.gmra.mxu3 %v2702_v17  ;;  %745 = vmatpush.msrb.mxu0 %v2830_v44  ;;  %v2919_v17 = vunpack.c.l.bf16 %v2130_v18  ;;  %v4064_v32 = vand.u32 4294901760, %v2931_v63  ;;  %v805_v18 = vand.u32 4294901760, %v804_v0  ;;  %v3045_v0 = vunpack.c.h.bf16 %v2141_v57 }
  0x6f   :  { %857 = vmatpush.msrb.mxu2 %v2841_v20  ;;  %891 = vmatpush.msrb.mxu3 %v2805_v42  ;;  %v794_v27 = vsub.f32 %v2877_v3, %v4068_v5  ;;  %v3095_v5 = vsub.f32 %v3067_v40, %v3067_v40 }
  0x70   :  { %660 = vmatpush.msra.mxu1 %v2657_v14  ;;  %746 = vmatpush.msrb.mxu0 %v2834_v19  ;;  %v789_v14 = vsub.f32 %v2863_v13, %v4069_v9  ;;  %v2947_v23 = vsub.f32 %v2919_v17, %v2919_v17  ;;  %v809_v7 = vsub.f32 %v2931_v63, %v4064_v32 }
  0x71   :  { %664 = vmatmul.f32.vlgmr.msra.gmra.mxu1 %v515_v47  ;;  %859 = vmatpush.msrb.mxu2 %v2856_v15  ;;  %v795_v43 = vand.u32 4294901760, %v794_v27  ;;  %v4063_v27 = vand.u32 4294901760, %v2997_v33  ;;  %v3081_v57 = vsub.f32 %v3045_v0, %v3045_v0 }
  0x72   :  { %771 = vmatpush.msrb.mxu1 %v770_v41  ;;  %892 = vmatpush.msrb.mxu3 %v2816_v55  ;;  %v790_v47 = vand.u32 4294901760, %v789_v14  ;;  %v4062_v60 = vand.u32 4294901760, %v2947_v23  ;;  %v3012_v41 = vsub.f32 %v2977_v46, %v2977_v46  ;;  %v810_v14 = vand.u32 4294901760, %v809_v7 }
  0x73   :  { %747 = vmatpush.msrb.mxu0 %v2846_v22  ;;  %861 = vmatpush.msrb.mxu2 %v2863_v13  ;;  %v820_v7 = vand.u32 4294901760, %v819_v4  ;;  %v825_v4 = vand.u32 4294901760, %v824_v50  ;;  %v4117_v29 = vand.u32 4294901760, %v3081_v57 }
  0x74   :  { %776 = vmatpush.msrb.mxu1 %v775_v51  ;;  %893 = vmatpush.msrb.mxu3 %v2830_v44  ;;  %v814_v6 = vsub.f32 %v2947_v23, %v4062_v60  ;;  %v3018_v51 = vunpack.c.l.bf16 %v2142_v26  ;;  %v761_v26 = vsub.f32 %v2989_v38, %v4073_v28 }
  0x75   :  { %748 = vmatpush.msrb.mxu0 %v2870_v35  ;;  %863 = vmatpush.msrb.mxu2 %v2877_v3 }
  0x76   :  { %781 = vmatpush.msrb.mxu1 %v780_v48  ;;  %894 = vmatpush.msrb.mxu3 %v2834_v19  ;;  %v3027_v48 = vunpack.c.l.bf16 %v2127_v2  ;;  %v2140_v2 = vld [vmem:[%s4037_s6 + $0xe8] sm:$0xff]   ;;  %v762_v32 = vand.u32 4294901760, %v761_v26 }
  0x77   :  { %749 = vmatpush.msrb.mxu0 %v2887_v8  ;;  %865 = vmatpush.msrb.mxu2 %v2900_v10  ;;  %v3073_v60 = vunpack.c.h.bf16 %v2140_v2  ;;  %v3086_v30 = vunpack.c.l.bf16 %v2140_v2 }
  0x78   :  { %786 = vmatpush.msrb.mxu1 %v785_v31  ;;  %895 = vmatpush.msrb.mxu3 %v2846_v22  ;;  %4116 = vst [vmem:[#allocation5_spill] sm:$0xff] %v3027_v48  ;;  %v3038_v31 = vsub.f32 %v3004_v52, %v3004_v52 }
  0x79   :  { %750 = vmatpush.msrb.mxu0 %v2902_v39  ;;  %867 = vmatpush.msrb.mxu2 %v2917_v21 }
  0x7a   :  { %791 = vmatpush.msrb.mxu1 %v790_v47  ;;  %896 = vmatpush.msrb.mxu3 %v2870_v35  ;;  %v815_v47 = vand.u32 4294901760, %v814_v6  ;;  %v3065_v6 = vsub.f32 %v3027_v48, %v3027_v48  ;;  %v4071_v61 = vand.u32 4294901760, %v3038_v31 }
  0x7b   :  { %751 = vmatpush.msrb.mxu0 %v2919_v17  ;;  %869 = vmatpush.msrb.mxu2 %v2931_v63 }
  0x7c   :  { %796 = vmatpush.msrb.mxu1 %v795_v43  ;;  %897 = vmatpush.msrb.mxu3 %v2887_v8  ;;  %v4067_v43 = vand.u32 4294901760, %v3012_v41  ;;  %v1014_v2 = vsub.f32 %v3038_v31, %v4071_v61 }
  0x7d   :  { %752 = vmatpush.msrb.mxu0 %v2933_v24  ;;  %871 = vmatpush.msrb.mxu2 %v2947_v23 }
  0x7e   :  { %801 = vmatpush.msrb.mxu1 %v800_v54  ;;  %898 = vmatpush.msrb.mxu3 %v2902_v39  ;;  %v3057_v54 = vsub.f32 %v3018_v51, %v3018_v51 }
  0x7f   :  { %753 = vmatpush.msrb.mxu0 %v2949_v34  ;;  %873 = vmatpush.msrb.mxu2 %v2962_v49 }
  0x80   :  { %806 = vmatpush.msrb.mxu1 %v805_v18  ;;  %899 = vmatpush.msrb.mxu3 %v2919_v17  ;;  %v829_v18 = vsub.f32 %v2997_v33, %v4063_v27  ;;  %v834_v27 = vsub.f32 %v3012_v41, %v4067_v43  ;;  %v4074_v36 = vand.u32 4294901760, %v3057_v54  ;;  %v4076_v43 = vand.u32 4294901760, %v3065_v6 }
  0x81   :  { %754 = vmatpush.msrb.mxu0 %v2964_v58  ;;  %875 = vmatpush.msrb.mxu2 %v2975_v53 }
  0x82   :  { %811 = vmatpush.msrb.mxu1 %v810_v14  ;;  %900 = vmatpush.msrb.mxu3 %v2933_v24  ;;  %v4072_v14 = vand.u32 4294901760, %v3034_v25  ;;  %v830_v50 = vand.u32 4294901760, %v829_v18  ;;  %v835_v18 = vand.u32 4294901760, %v834_v27  ;;  %v1019_v61 = vsub.f32 %v3057_v54, %v4074_v36 }
  0x83   :  { %755 = vmatpush.msrb.mxu0 %v2977_v46  ;;  %877 = vmatpush.msrb.mxu2 %v2997_v33  ;;  %v4077_v27 = vand.u32 4294901760, %v3095_v5  ;;  %v1015_v36 = vand.u32 4294901760, %v1014_v2 }
  0x84   :  { %816 = vmatpush.msrb.mxu1 %v815_v47  ;;  %901 = vmatpush.msrb.mxu3 %v2949_v34  ;;  %v2139_v47 = vld [vmem:[%s4037_s6 + $0xe0] sm:$0xff]   ;;  %v839_v26 = vsub.f32 %v3034_v25, %v4072_v14  ;;  %v3119_v14 = vsub.f32 %v3086_v30, %v3086_v30  ;;  %v1020_v2 = vand.u32 4294901760, %v1019_v61 }
  0x85   :  { %756 = vmatpush.msrb.mxu0 %v3002_v56  ;;  %879 = vmatpush.msrb.mxu2 %v3012_v41  ;;  %v3111_v59 = vunpack.c.h.bf16 %v2139_v47  ;;  %v3130_v28 = vunpack.c.l.bf16 %v2139_v47 }
  0x86   :  { %821 = vmatpush.msrb.mxu1 %v820_v7  ;;  %902 = vmatpush.msrb.mxu3 %v2964_v58  ;;  %v3107_v7 = vsub.f32 %v3073_v60, %v3073_v60  ;;  %v840_v11 = vand.u32 4294901760, %v839_v26 }
  0x87   :  { %757 = vmatpush.msrb.mxu0 %v3027_v48  ;;  %881 = vmatpush.msrb.mxu2 %v3034_v25  ;;  %v3142_v47 = vsub.f32 %v3111_v59, %v3111_v59 }
  0x88   :  { %826 = vmatpush.msrb.mxu1 %v825_v4  ;;  %903 = vmatpush.msrb.mxu3 %v2977_v46  ;;  %v2138_v4 = vld [vmem:[%s4037_s6 + $0xd8] sm:$0xff]   ;;  %v4080_v9 = vand.u32 4294901760, %v3107_v7 }
  0x89   :  { %763 = vmatmul.f32.vlgmr.msrb.gmra.mxu0 %v762_v32  ;;  %883 = vmatpush.msrb.mxu2 %v3065_v6  ;;  %v844_v32 = vsub.f32 %v3065_v6, %v4076_v43  ;;  %v3160_v43 = vsub.f32 %v3130_v28, %v3130_v28  ;;  %v3162_v61 = vunpack.c.l.bf16 %v2138_v4 }
  0x8a   :  { %915 = vmatpush.msra.mxu0 %v768_v62  ;;  %831 = vmatpush.msrb.mxu1 %v830_v50  ;;  %v1024_v62 = vsub.f32 %v3081_v57, %v4117_v29  ;;  %v3144_v50 = vunpack.c.h.bf16 %v2138_v4  ;;  %v1029_v29 = vsub.f32 %v3095_v5, %v4077_v27  ;;  %v4079_v27 = vand.u32 4294901760, %v3142_v47 }
  0x8b   :  { %904 = vmatpush.msrb.mxu3 %v3002_v56  ;;  %987 = vmatpush.msra.mxu2 %v3004_v52  ;;  %v3176_v4 = vunpack.c.h.bf16 %v2137_v37 }
  0x8c   :  { %918 = vmatpush.msra.mxu0 %v773_v12  ;;  %836 = vmatpush.msrb.mxu1 %v835_v18  ;;  %v4118_v12 = vand.u32 4294901760, %v2841_v20  ;;  %v845_v18 = vand.u32 4294901760, %v844_v32  ;;  %v1034_v20 = vsub.f32 %v3107_v7, %v4080_v9  ;;  %v4120_v32 = vand.u32 4294901760, %v2856_v15  ;;  %v2136_v15 = vld [vmem:[%s4037_s6 + $0xc8] sm:$0xff]  }
  0x8d   :  { %905 = vmatpush.msrb.mxu3 %v3027_v48  ;;  %886 = vmatmul.f32.vlgmr.msrb.gmra.mxu2 %v2989_v38  ;;  %v1025_v26 = vand.u32 4294901760, %v1024_v62  ;;  %v3174_v48 = vsub.f32 %v3144_v50, %v3144_v50  ;;  %v1030_v62 = vand.u32 4294901760, %v1029_v29  ;;  %v3203_v29 = vsub.f32 %v3176_v4, %v3176_v4 }
  0x8e   :  { %921 = vmatpush.msra.mxu0 %v4118_v12  ;;  %988 = vmatpush.msra.mxu2 %v3018_v51  ;;  %v4119_v12 = vand.u32 4294901760, %v2989_v38  ;;  %v4122_v38 = vand.u32 4294901760, %v2863_v13  ;;  %v1044_v13 = vsub.f32 %v3142_v47, %v4079_v27  ;;  %v3219_v9 = vunpack.c.l.bf16 %v2136_v15 }
  0x8f   :  { %1016 = vmatpush.msra.mxu3 %v1015_v36  ;;  %841 = vmatpush.msrb.mxu1 %v840_v11  ;;  %v4121_v11 = vand.u32 4294901760, %v3119_v14 }
  0x90   :  { %909 = vmatmul.f32.vlgmr.msrb.gmra.mxu3 %v4119_v12  ;;  %924 = vmatpush.msra.mxu0 %v4120_v32  ;;  %v4081_v12 = vand.u32 4294901760, %v3160_v43  ;;  %v3190_v32 = vsub.f32 %v3162_v61, %v3162_v61 }
  0x91   :  { %989 = vmatpush.msra.mxu2 %v3045_v0  ;;  %1021 = vmatpush.msra.mxu3 %v1020_v2  ;;  %v1039_v36 = vsub.f32 %v3119_v14, %v4121_v11  ;;  %v3192_v2 = vunpack.c.l.bf16 %v2137_v37  ;;  %v1035_v11 = vand.u32 4294901760, %v1034_v20  ;;  %v3205_v37 = vunpack.c.h.bf16 %v2136_v15 }
  0x92   :  { %846 = vmatpush.msrb.mxu1 %v845_v18  ;;  %927 = vmatpush.msra.mxu0 %v4122_v38  ;;  %v4082_v18 = vand.u32 4294901760, %v3174_v48  ;;  %v4123_v38 = vand.u32 4294901760, %v2877_v3  ;;  %v2135_v3 = vld [vmem:[%s4037_s6 + $0xc0] sm:$0xff]  }
  0x93   :  { %848 = vmatmul.f32.vlgmr.msrb.gmra.mxu1 %v2954_v45  ;;  %990 = vmatpush.msra.mxu2 %v3067_v40  ;;  %v1040_v20 = vand.u32 4294901760, %v1039_v36  ;;  %v3217_v27 = vsub.f32 %v3192_v2, %v3192_v2  ;;  %v4124_v36 = vand.u32 4294901760, %v2900_v10  ;;  %v4125_v10 = vand.u32 4294901760, %v2917_v21 }
  0x94   :  { %966 = vmatpush.msra.mxu1 %v2795_v1  ;;  %1026 = vmatpush.msra.mxu3 %v1025_v26  ;;  %v1049_v1 = vsub.f32 %v3160_v43, %v4081_v12  ;;  %v4083_v26 = vand.u32 4294901760, %v3190_v32  ;;  %v1054_v15 = vsub.f32 %v3174_v48, %v4082_v18  ;;  %v3235_v12 = vsub.f32 %v3205_v37, %v3205_v37 }
  0x95   :  { %930 = vmatpush.msra.mxu0 %v4123_v38  ;;  %991 = vmatpush.msra.mxu2 %v3073_v60  ;;  %v1063_v38 = vand.u32 4294901760, %v3203_v29  ;;  %v3249_v18 = vsub.f32 %v3219_v9, %v3219_v9  ;;  %v4126_v21 = vand.u32 4294901760, %v2931_v63 }
  0x96   :  { %967 = vmatpush.msra.mxu1 %v2805_v42  ;;  %1031 = vmatpush.msra.mxu3 %v1030_v62  ;;  %v243_v42 = vperm.slane %v2603_v16, 3  ;;  %v1045_v62 = vand.u32 4294901760, %v1044_v13  ;;  %v4127_v13 = vand.u32 4294901760, %v2947_v23 }
  0x97   :  { %933 = vmatpush.msra.mxu0 %v4124_v36  ;;  %992 = vmatpush.msra.mxu2 %v3086_v30  ;;  %v3240_v36 = vunpack.c.h.bf16 %v2135_v3 }
  0x98   :  { %968 = vmatpush.msra.mxu1 %v2816_v55  ;;  %1036 = vmatpush.msra.mxu3 %v1035_v11  ;;  %v1050_v55 = vand.u32 4294901760, %v1049_v1  ;;  %v1059_v11 = vsub.f32 %v3190_v32, %v4083_v26  ;;  %v1064_v1 = vsub.f32 %v3203_v29, %v1063_v38  ;;  %v1073_v26 = vand.u32 4294901760, %v3235_v12 }
  0x99   :  { %936 = vmatpush.msra.mxu0 %v4125_v10  ;;  %993 = vmatpush.msra.mxu2 %v3111_v59  ;;  %v3254_v10 = vunpack.c.l.bf16 %v2135_v3  ;;  %v3268_v63 = vsub.f32 %v3240_v36, %v3240_v36  ;;  %v4128_v3 = vand.u32 4294901760, %v3217_v27 }
  0x9a   :  { %969 = vmatpush.msra.mxu1 %v2830_v44  ;;  %1041 = vmatpush.msra.mxu3 %v1040_v20  ;;  %v3256_v44 = vand.u32 4294901760, %v243_v42  ;;  %v1055_v20 = vand.u32 4294901760, %v1054_v15  ;;  %v1078_v15 = vand.u32 4294901760, %v3249_v18 }
  0x9b   :  { %939 = vmatpush.msra.mxu0 %v4126_v21  ;;  %994 = vmatpush.msra.mxu2 %v3130_v28  ;;  %v4129_v21 = vand.u32 4294901760, %v2962_v49  ;;  %v3280_v23 = vsub.f32 %v3254_v10, %v3254_v10  ;;  %v4130_v49 = vand.u32 4294901760, %v2975_v53 }
  0x9c   :  { %970 = vmatpush.msra.mxu1 %v2834_v19  ;;  %1046 = vmatpush.msra.mxu3 %v1045_v62  ;;  %v1060_v19 = vand.u32 4294901760, %v1059_v11  ;;  %v1069_v62 = vsub.f32 %v3217_v27, %v4128_v3  ;;  %v1083_v11 = vand.u32 4294901760, %v3268_v63 }
  0x9d   :  { %942 = vmatpush.msra.mxu0 %v4127_v13  ;;  %995 = vmatpush.msra.mxu2 %v3144_v50  ;;  %v3283_v13 = vsub.f32 %v243_v42, %v3256_v44  ;;  %v1088_v53 = vand.u32 4294901760, %v3280_v23 }
  0x9e   :  { %971 = vmatpush.msra.mxu1 %v2846_v22  ;;  %1051 = vmatpush.msra.mxu3 %v1050_v55  ;;  %v1065_v22 = vand.u32 4294901760, %v1064_v1  ;;  %v1074_v55 = vsub.f32 %v3235_v12, %v1073_v26  ;;  %v1070_v42 = vand.u32 4294901760, %v1069_v62  ;;  %v4133_v62 = vand.u32 4294901760, %v3034_v25 }
  0x9f   :  { %945 = vmatpush.msra.mxu0 %v4129_v21  ;;  %996 = vmatpush.msra.mxu2 %v3162_v61  ;;  %v1005_v1 = vand.u32 4294901760, %v3283_v13 }
  0xa0   :  { %972 = vmatpush.msra.mxu1 %v2870_v35  ;;  %1056 = vmatpush.msra.mxu3 %v1055_v20  ;;  %v1079_v35 = vsub.f32 %v3249_v18, %v1078_v15  ;;  %v4131_v20 = vand.u32 4294901760, %v2997_v33  ;;  %v1075_v3 = vand.u32 4294901760, %v1074_v55  ;;  %v1084_v33 = vsub.f32 %v3268_v63, %v1083_v11 }
  0xa1   :  { %948 = vmatpush.msra.mxu0 %v4130_v49  ;;  %997 = vmatpush.msra.mxu2 %v3176_v4 }
  0xa2   :  { %973 = vmatpush.msra.mxu1 %v2887_v8  ;;  %1061 = vmatpush.msra.mxu3 %v1060_v19  ;;  %v4132_v8 = vand.u32 4294901760, %v3012_v41  ;;  %v1080_v19 = vand.u32 4294901760, %v1079_v35  ;;  %v1006_v41 = vsub.f32 %v3283_v13, %v1005_v1  ;;  %v1085_v25 = vand.u32 4294901760, %v1084_v33 }
  0xa3   :  { %951 = vmatpush.msra.mxu0 %v4131_v20  ;;  %998 = vmatpush.msra.mxu2 %v3192_v2 }
  0xa4   :  { %974 = vmatpush.msra.mxu1 %v2902_v39  ;;  %1066 = vmatpush.msra.mxu3 %v1065_v22  ;;  %v1089_v39 = vsub.f32 %v3280_v23, %v1088_v53  ;;  %v1007_v22 = vand.u32 4294901760, %v1006_v41 }
  0xa5   :  { %954 = vmatpush.msra.mxu0 %v4132_v8  ;;  %999 = vmatpush.msra.mxu2 %v3205_v37 }
  0xa6   :  { %975 = vmatpush.msra.mxu1 %v2919_v17  ;;  %1071 = vmatpush.msra.mxu3 %v1070_v42  ;;  %v4134_v17 = vand.u32 4294901760, %v3065_v6  ;;  %v1090_v21 = vand.u32 4294901760, %v1089_v39  ;;  %v2106_v39 = vld [vmem:[%s4036_s5 + $0x30] sm:$0xff]  }
  0xa7   :  { %957 = vmatpush.msra.mxu0 %v4133_v62  ;;  %1000 = vmatpush.msra.mxu2 %v3219_v9 }
  0xa8   :  { %976 = vmatpush.msra.mxu1 %v2933_v24  ;;  %1076 = vmatpush.msra.mxu3 %v1075_v3  ;;  %v4135_v24 = vand.u32 4294901760, %v3038_v31 }
  0xa9   :  { %960 = vmatpush.msra.mxu0 %v4134_v17  ;;  %1001 = vmatpush.msra.mxu2 %v3240_v36 }
  0xaa   :  { %977 = vmatpush.msra.mxu1 %v2949_v34  ;;  %1081 = vmatpush.msra.mxu3 %v1080_v19  ;;  %v4136_v34 = vand.u32 4294901760, %v3057_v54 }
  0xab   :  { %962 = vmatmul.f32.vlgmr.msra.gmra.mxu0 %v2954_v45  ;;  %1002 = vmatpush.msra.mxu2 %v3254_v10 }
  0xac   :  { %1098 = vmatpush.msrb.mxu0 %v3038_v31  ;;  %978 = vmatpush.msra.mxu1 %v2964_v58  ;;  %v4137_v58 = vand.u32 4294901760, %v3081_v57  ;;  %v4139_v31 = vand.u32 4294901760, %v3095_v5 }
  0xad   :  { %1086 = vmatpush.msra.mxu3 %v1085_v25  ;;  %1160 = vmatpush.msrb.mxu2 %v4135_v24 }
  0xae   :  { %1100 = vmatpush.msrb.mxu0 %v3057_v54  ;;  %979 = vmatpush.msra.mxu1 %v2977_v46  ;;  %v4138_v46 = vld [vmem:[#allocation5_spill] sm:$0xff]  ;;  %v244_v54 = vperm.slane %v2603_v16, 4 }
  0xaf   :  { %1091 = vmatpush.msra.mxu3 %v1090_v21  ;;  %1008 = vmatmul.f32.vlgmr.msra.gmra.mxu2 %v1007_v22 }
  0xb0   :  { %1102 = vmatpush.msrb.mxu0 %v3081_v57  ;;  %1163 = vmatpush.msrb.mxu2 %v4136_v34  ;;  %v250_v57 = vsel %vm249_vm0, %v244_v54, 0  ;;  %v2104_v54 = vld [vmem:[%s4036_s5 + $0x20] sm:$0xff]  }
  0xb1   :  { %1211 = vmatpush.msrb.mxu3 %v3004_v52  ;;  %980 = vmatpush.msra.mxu1 %v3002_v56  ;;  %v4140_v56 = vand.u32 4294901760, %v3107_v7 }
  0xb2   :  { %1093 = vmatmul.f32.vlgmr.msra.gmra.mxu3 %v3256_v44  ;;  %1104 = vmatpush.msrb.mxu0 %v3095_v5  ;;  %v4142_v5 = vand.u32 4294901760, %v3142_v47 }
  0xb3   :  { %1166 = vmatpush.msrb.mxu2 %v4137_v58  ;;  %1212 = vmatpush.msrb.mxu3 %v3018_v51  ;;  %v3531_v58 = vunpack.c.h.bf16 %v2106_v39 }
  0xb4   :  { %981 = vmatpush.msra.mxu1 %v4138_v46  ;;  %1106 = vmatpush.msrb.mxu0 %v3107_v7 }
  0xb5   :  { %983 = vmatmul.f32.vlgmr.msra.gmra.mxu1 %v2954_v45  ;;  %1169 = vmatpush.msrb.mxu2 %v4139_v31  ;;  %v4141_v45 = vand.u32 4294901760, %v3119_v14  ;;  %v2105_v31 = vld [vmem:[%s4036_s5 + $0x28] sm:$0xff]  }
  0xb6   :  { %1135 = vmatpush.msrb.mxu1 %v3004_v52  ;;  %1213 = vmatpush.msrb.mxu3 %v3045_v0  ;;  %v4143_v52 = vand.u32 4294901760, %v3160_v43 }
  0xb7   :  { %1108 = vmatpush.msrb.mxu0 %v3119_v14  ;;  %1172 = vmatpush.msrb.mxu2 %v4140_v56  ;;  %v2145_v14 = vld [vmem:[%s4037_s6 + $0x110] sm:$0xff]  }
  0xb8   :  { %1136 = vmatpush.msrb.mxu1 %v3018_v51  ;;  %1214 = vmatpush.msrb.mxu3 %v3067_v40  ;;  %v4144_v51 = vand.u32 4294901760, %v3174_v48 }
  0xb9   :  { %1110 = vmatpush.msrb.mxu0 %v3142_v47  ;;  %1175 = vmatpush.msrb.mxu2 %v4141_v45  ;;  %v2144_v47 = vld [vmem:[%s4037_s6 + $0x108] sm:$0xff]   ;;  %v3554_v45 = vunpack.c.l.bf16 %v2106_v39  ;;  %v3619_v39 = vunpack.c.l.bf16 %v2104_v54 }
  0xba   :  { %1137 = vmatpush.msrb.mxu1 %v3045_v0  ;;  %1215 = vmatpush.msrb.mxu3 %v3073_v60 }
  0xbb   :  { %1112 = vmatpush.msrb.mxu0 %v3160_v43  ;;  %1178 = vmatpush.msrb.mxu2 %v4142_v5  ;;  %v30_v43 = vld [vmem:[%s4032_s1] sm:$0x3] }
  0xbc   :  { %1138 = vmatpush.msrb.mxu1 %v3067_v40  ;;  %1216 = vmatpush.msrb.mxu3 %v3086_v30  ;;  %v4145_v40 = vand.u32 4294901760, %v3190_v32 }
  0xbd   :  { %1114 = vmatpush.msrb.mxu0 %v3174_v48  ;;  %1181 = vmatpush.msrb.mxu2 %v4143_v52  ;;  %v31_v48 = vld [vmem:[%s4033_s2] sm:$0x3] }
  0xbe   :  { %1139 = vmatpush.msrb.mxu1 %v3073_v60  ;;  %1217 = vmatpush.msrb.mxu3 %v3111_v59  ;;  %v2146_v60 = vld [vmem:[%s4037_s6 + $0x118] sm:$0xff]  }
  0xbf   :  { %1116 = vmatpush.msrb.mxu0 %v3190_v32  ;;  %1184 = vmatpush.msrb.mxu2 %v4144_v51  ;;  %v3393_v0 = vunpack.c.h.bf16 %v2146_v60  ;;  %v3399_v6 = vunpack.c.l.bf16 %v2146_v60  ;;  %v3443_v32 = vunpack.c.h.bf16 %v2144_v47  ;;  %v3566_v60 = vsub.f32 %v3531_v58, %v3531_v58 }
  0xc0   :  { %1140 = vmatpush.msrb.mxu1 %v3086_v30  ;;  %1218 = vmatpush.msrb.mxu3 %v3130_v28  ;;  %v32_v30 = vmul.f32 %v31_v48, %v30_v43  ;;  %v3568_v43 = vunpack.c.h.bf16 %v2105_v31 }
  0xc1   :  { %1118 = vmatpush.msrb.mxu0 %v3203_v29  ;;  %1187 = vmatpush.msrb.mxu2 %v4145_v40  ;;  %v3413_v16 = vsub.f32 %v3393_v0, %v3393_v0  ;;  %v3423_v7 = vsub.f32 %v3399_v6, %v3399_v6 }
  0xc2   :  { %1141 = vmatpush.msrb.mxu1 %v3111_v59  ;;  %1219 = vmatpush.msrb.mxu3 %v3144_v50  ;;  %v4146_v59 = vand.u32 4294901760, %v3217_v27  ;;  %2151 = vtanh.f32 %v32_v30 }
  0xc3   :  { %1120 = vmatpush.msrb.mxu0 %v3217_v27  ;;  %1190 = vmatpush.msrb.mxu2 %v1063_v38  ;;  %v3425_v27 = vunpack.c.l.bf16 %v2145_v14  ;;  %v2143_v38 = vld [vmem:[%s4037_s6 + $0x100] sm:$0xff]  }
  0xc4   :  { %1142 = vmatpush.msrb.mxu1 %v3130_v28  ;;  %1220 = vmatpush.msrb.mxu3 %v3162_v61  ;;  %v3415_v28 = vunpack.c.h.bf16 %v2145_v14  ;;  %v3485_v20 = vunpack.c.h.bf16 %v2143_v38  ;;  %v3512_v25 = vunpack.c.l.bf16 %v2143_v38 }
  0xc5   :  { %1122 = vmatpush.msrb.mxu0 %v3235_v12  ;;  %1193 = vmatpush.msrb.mxu2 %v4146_v59  ;;  %v3451_v29 = vsub.f32 %v3425_v27, %v3425_v27 }
  0xc6   :  { %1143 = vmatpush.msrb.mxu1 %v3144_v50  ;;  %1221 = vmatpush.msrb.mxu3 %v3176_v4  ;;  %v3441_v12 = vsub.f32 %v3415_v28, %v3415_v28  ;;  %v3519_v21 = vsub.f32 %v3485_v20, %v3485_v20 }
  0xc7   :  { %1124 = vmatpush.msrb.mxu0 %v3249_v18  ;;  %1196 = vmatpush.msrb.mxu2 %v1073_v26  ;;  %v3456_v26 = vunpack.c.l.bf16 %v2144_v47  ;;  %v1281_v8 = vand.u32 4294901760, %v3451_v29  ;;  %v3582_v47 = vunpack.c.l.bf16 %v2105_v31 }
  0xc8   :  { %1144 = vmatpush.msrb.mxu1 %v3162_v61  ;;  %1222 = vmatpush.msrb.mxu3 %v3192_v2  ;;  %v2152_v50 = vpop.eup %2151  ;;  %v3435_v61 = vand.u32 4294901760, %v250_v57  ;;  %v1276_v42 = vand.u32 4294901760, %v3441_v12  ;;  %v1296_v52 = vand.u32 4294901760, %v3519_v21 }
  0xc9   :  { %1126 = vmatpush.msrb.mxu0 %v3268_v63  ;;  %1199 = vmatpush.msrb.mxu2 %v1078_v15  ;;  %v41_v18 = vperm.slane %v2152_v50, 1  ;;  %v2107_v63 = vld [vmem:[%s4036_s5 + $0x38] sm:$0xff]   ;;  %v40_v15 = vperm.slane %v2152_v50, 0  ;;  %v3496_v3 = vsub.f32 %v3456_v26, %v3456_v26  ;;  %v1282_v24 = vsub.f32 %v3451_v29, %v1281_v8 }
  0xca   :  { %1145 = vmatpush.msrb.mxu1 %v3176_v4  ;;  %1223 = vmatpush.msrb.mxu3 %v3205_v37  ;;  %v1266_v4 = vand.u32 4294901760, %v3413_v16  ;;  %v3467_v55 = vsub.f32 %v250_v57, %v3435_v61  ;;  %v3502_v62 = vunpack.c.l.bf16 %v2107_v63  ;;  %v1277_v17 = vsub.f32 %v3441_v12, %v1276_v42 }
  0xcb   :  { %1128 = vmatpush.msrb.mxu0 %v3280_v23  ;;  %1202 = vmatpush.msrb.mxu2 %v1083_v11  ;;  %v42_v23 = vrot.slane %v41_v18, 6  ;;  %v3479_v11 = vsub.f32 %v3443_v32, %v3443_v32  ;;  %v1291_v34 = vand.u32 4294901760, %v3496_v3  ;;  %v1283_v51 = vand.u32 4294901760, %v1282_v24 }
  0xcc   :  { %1146 = vmatpush.msrb.mxu1 %v3192_v2  ;;  %1224 = vmatpush.msrb.mxu3 %v3219_v9  ;;  %v1271_v2 = vand.u32 4294901760, %v3423_v7  ;;  %v1267_v49 = vsub.f32 %v3413_v16, %v1266_v4  ;;  %v1250_v19 = vand.u32 4294901760, %v3467_v55  ;;  %v3541_v46 = vsub.f32 %v3502_v62, %v3502_v62 }
  0xcd   :  { %1131 = vmatmul.f32.vlgmr.msrb.gmra.mxu0 %v3283_v13  ;;  %1205 = vmatpush.msrb.mxu2 %v1088_v53  ;;  %v44_v35 = vsel %vm43_vm1, %v40_v15, %v42_v23  ;;  %v3487_v53 = vunpack.c.h.bf16 %v2107_v63  ;;  %v1278_v56 = vand.u32 4294901760, %v1277_v17  ;;  %v1292_v40 = vsub.f32 %v3496_v3, %v1291_v34 }
  0xce   :  { %1240 = vmatpush.msra.mxu0 %v3393_v0  ;;  %1147 = vmatpush.msrb.mxu1 %v3205_v37  ;;  %v38_v37 = vld [vmem:[%s4031_s0] sm:$0xf]  ;;  %v1268_v41 = vand.u32 4294901760, %v1267_v49  ;;  %v1460_v30 = vand.u32 4294901760, %v3541_v46  ;;  %v3580_v57 = vsub.f32 %v3554_v45, %v3554_v45  ;;  %v1297_v18 = vsub.f32 %v3519_v21, %v1296_v52 }
  0xcf   :  { %1225 = vmatpush.msrb.mxu3 %v3240_v36  ;;  %1319 = vmatpush.msra.mxu2 %v3413_v16  ;;  %v46_v33 = vadd.f32 %v44_v35, %v38_v37  ;;  %v1293_v38 = vand.u32 4294901760, %v1292_v40  ;;  %v1465_v63 = vand.u32 4294901760, %v3566_v60  ;;  %v3596_v15 = vsub.f32 %v3568_v43, %v3568_v43 }
  0xd0   :  { %1241 = vmatpush.msra.mxu0 %v3399_v6  ;;  %1148 = vmatpush.msrb.mxu1 %v3219_v9  ;;  %v1272_v9 = vsub.f32 %v3423_v7, %v1271_v2  ;;  %v3598_v23 = vunpack.c.h.bf16 %v2104_v54  ;;  %v1461_v37 = vsub.f32 %v3541_v46, %v1460_v30  ;;  %v1470_v35 = vand.u32 4294901760, %v3580_v57 }
  0xd1   :  { %1226 = vmatpush.msrb.mxu3 %v3254_v10  ;;  %1207 = vmatmul.f32.vlgmr.msrb.gmra.mxu2 %v3256_v44  ;;  %1423 = vst [vmem:[#allocation1] ss:$4 sm:$0xff] %v46_v33  ;;  %v2103_v33 = vld [vmem:[%s4036_s5 + $0x18] sm:$0xff]   ;;  %v1475_v17 = vand.u32 4294901760, %v3596_v15 }
  0xd2   :  { %1242 = vmatpush.msra.mxu0 %v3415_v28  ;;  %1321 = vmatpush.msra.mxu2 %v3423_v7  ;;  %v1273_v22 = vand.u32 4294901760, %v1272_v9  ;;  %v3612_v9 = vsub.f32 %v3582_v47, %v3582_v47  ;;  %v1462_v24 = vand.u32 4294901760, %v1461_v37 }
  0xd3   :  { %1348 = vmatpush.msra.mxu3 %v3393_v0  ;;  %1149 = vmatpush.msrb.mxu1 %v3240_v36  ;;  %v1286_v36 = vand.u32 4294901760, %v3479_v11 }
  0xd4   :  { %1228 = vmatmul.f32.vlgmr.msrb.gmra.mxu3 %v3256_v44  ;;  %1243 = vmatpush.msra.mxu0 %v3425_v27  ;;  %v3523_v44 = vsub.f32 %v3487_v53, %v3487_v53  ;;  %v1480_v31 = vand.u32 4294901760, %v3612_v9 }
  0xd5   :  { %1323 = vmatpush.msra.mxu2 %v3441_v12  ;;  %1349 = vmatpush.msra.mxu3 %v3399_v6  ;;  %v1287_v13 = vsub.f32 %v3479_v11, %v1286_v36  ;;  %v3649_v12 = vunpack.c.l.bf16 %v2103_v33 }
  0xd6   :  { %1150 = vmatpush.msrb.mxu1 %v3254_v10  ;;  %1244 = vmatpush.msra.mxu0 %v3443_v32  ;;  %v1251_v10 = vsub.f32 %v3467_v55, %v1250_v19  ;;  %v1455_v5 = vand.u32 4294901760, %v3523_v44 }
  0xd7   :  { %1154 = vmatmul.f32.vlgmr.msrb.gmra.mxu1 %v1005_v1  ;;  %1325 = vmatpush.msra.mxu2 %v3451_v29  ;;  %v3552_v1 = vsub.f32 %v3512_v25, %v3512_v25  ;;  %v1288_v59 = vand.u32 4294901760, %v1287_v13  ;;  %v3647_v13 = vsub.f32 %v3619_v39, %v3619_v39 }
  0xd8   :  { %1269 = vmatpush.msra.mxu1 %v1268_v41  ;;  %1350 = vmatpush.msra.mxu3 %v3415_v28  ;;  %v1252_v48 = vand.u32 4294901760, %v1251_v10  ;;  %v1456_v50 = vsub.f32 %v3523_v44, %v1455_v5  ;;  %v1466_v41 = vsub.f32 %v3566_v60, %v1465_v63  ;;  %v3633_v10 = vunpack.c.h.bf16 %v2103_v33 }
  0xd9   :  { %1245 = vmatpush.msra.mxu0 %v3456_v26  ;;  %1327 = vmatpush.msra.mxu2 %v3479_v11  ;;  %v1301_v14 = vand.u32 4294901760, %v3552_v1 }
  0xda   :  { %1274 = vmatpush.msra.mxu1 %v1273_v22  ;;  %1351 = vmatpush.msra.mxu3 %v3425_v27  ;;  %v1457_v16 = vand.u32 4294901760, %v1456_v50  ;;  %v3629_v22 = vsub.f32 %v3598_v23, %v3598_v23 }
  0xdb   :  { %1246 = vmatpush.msra.mxu0 %v3485_v20  ;;  %1329 = vmatpush.msra.mxu2 %v3496_v3  ;;  %v1302_v49 = vsub.f32 %v3552_v1, %v1301_v14 }
  0xdc   :  { %1279 = vmatpush.msra.mxu1 %v1278_v56  ;;  %1352 = vmatpush.msra.mxu3 %v3443_v32  ;;  %v2102_v56 = vld [vmem:[%s4036_s5 + $0x10] sm:$0xff]   ;;  %v1485_v40 = vand.u32 4294901760, %v3629_v22 }
  0xdd   :  { %1247 = vmatpush.msra.mxu0 %v3512_v25  ;;  %1331 = vmatpush.msra.mxu2 %v3519_v21  ;;  %v1303_v7 = vand.u32 4294901760, %v1302_v49  ;;  %v3664_v54 = vunpack.c.h.bf16 %v2102_v56  ;;  %v3681_v11 = vunpack.c.l.bf16 %v2102_v56  ;;  %v1910_v49 = vld [vmem:[%s4036_s5] sm:$0xff]  }
  0xde   :  { %1284 = vmatpush.msra.mxu1 %v1283_v51  ;;  %1353 = vmatpush.msra.mxu3 %v3456_v26  ;;  %v1476_v51 = vsub.f32 %v3596_v15, %v1475_v17  ;;  %v1486_v50 = vsub.f32 %v3629_v22, %v1485_v40 }
  0xdf   :  { %1253 = vmatmul.f32.vlgmr.msra.gmra.mxu0 %v1252_v48  ;;  %1333 = vmatpush.msra.mxu2 %v3552_v1  ;;  %v3662_v48 = vsub.f32 %v3633_v10, %v3633_v10 }
  0xe0   :  { %1373 = vmatpush.msrb.mxu0 %v1266_v4  ;;  %1289 = vmatpush.msra.mxu1 %v1288_v59  ;;  %v1298_v4 = vand.u32 4294901760, %v1297_v18  ;;  %v3679_v59 = vsub.f32 %v3649_v12, %v3649_v12  ;;  %v1487_v21 = vand.u32 4294901760, %v1486_v50 }
  0xe1   :  { %1354 = vmatpush.msra.mxu3 %v3485_v20  ;;  %1429 = vmatpush.msrb.mxu2 %v3487_v53  ;;  %v1495_v18 = vand.u32 4294901760, %v3662_v48 }
  0xe2   :  { %1376 = vmatpush.msrb.mxu0 %v1271_v2  ;;  %1294 = vmatpush.msra.mxu1 %v1293_v38  ;;  %v1471_v2 = vsub.f32 %v3580_v57, %v1470_v35  ;;  %v3693_v38 = vsub.f32 %v3664_v54, %v3664_v54 }
  0xe3   :  { %1355 = vmatpush.msra.mxu3 %v3512_v25  ;;  %1336 = vmatmul.f32.vlgmr.msra.gmra.mxu2 %v3467_v55  ;;  %v1481_v55 = vsub.f32 %v3612_v9, %v1480_v31 }
  0xe4   :  { %1379 = vmatpush.msrb.mxu0 %v1276_v42  ;;  %1430 = vmatpush.msrb.mxu2 %v3502_v62  ;;  %v1467_v42 = vand.u32 4294901760, %v1466_v41  ;;  %v1472_v29 = vand.u32 4294901760, %v1471_v2 }
  0xe5   :  { %1458 = vmatpush.msrb.mxu3 %v1457_v16  ;;  %1299 = vmatpush.msra.mxu1 %v1298_v4  ;;  %v1424_v16 = vld.sshfl [vmem:[#allocation1] sm:$0xff pattern:$0x73625140]  ;;  %v1505_v4 = vand.u32 4294901760, %v3693_v38 }
  0xe6   :  { %1359 = vmatmul.f32.vlgmr.msra.gmra.mxu3 %v1250_v19  ;;  %1382 = vmatpush.msrb.mxu0 %v1281_v8  ;;  %v2101_v8 = vld [vmem:[%s4036_s5 + $0x8] sm:$0xff]   ;;  %v1490_v19 = vand.u32 4294901760, %v3647_v13 }
  0xe7   :  { %1431 = vmatpush.msrb.mxu2 %v3531_v58  ;;  %1463 = vmatpush.msrb.mxu3 %v1462_v24  ;;  %v3695_v37 = vunpack.c.h.bf16 %v2101_v8  ;;  %v3712_v33 = vunpack.c.l.bf16 %v2101_v8  ;;  %v3726_v24 = vunpack.c.h.bf16 %v1910_v49 }
  0xe8   :  { %1304 = vmatpush.msra.mxu1 %v1303_v7  ;;  %1385 = vmatpush.msrb.mxu0 %v1286_v36  ;;  %v1477_v36 = vand.u32 4294901760, %v1476_v51  ;;  %v1491_v3 = vsub.f32 %v3647_v13, %v1490_v19 }
  0xe9   :  { %1306 = vmatmul.f32.vlgmr.msra.gmra.mxu1 %v3435_v61  ;;  %1432 = vmatpush.msrb.mxu2 %v3554_v45  ;;  %v3724_v41 = vsub.f32 %v3695_v37, %v3695_v37  ;;  %v3739_v2 = vsub.f32 %v3712_v33, %v3712_v33 }
  0xea   :  { %1408 = vmatpush.msrb.mxu1 %v3393_v0  ;;  %1468 = vmatpush.msrb.mxu3 %v1467_v42  ;;  %v1482_v0 = vand.u32 4294901760, %v1481_v55  ;;  %v1492_v1 = vand.u32 4294901760, %v1491_v3  ;;  %v1506_v42 = vsub.f32 %v3693_v38, %v1505_v4 }
  0xeb   :  { %1388 = vmatpush.msrb.mxu0 %v1291_v34  ;;  %1433 = vmatpush.msrb.mxu2 %v3568_v43  ;;  %v1500_v34 = vand.u32 4294901760, %v3679_v59  ;;  %v1515_v51 = vand.u32 4294901760, %v3724_v41 }
  0xec   :  { %1409 = vmatpush.msrb.mxu1 %v3399_v6  ;;  %1473 = vmatpush.msrb.mxu3 %v1472_v29  ;;  %v3710_v6 = vsub.f32 %v3681_v11, %v3681_v11  ;;  %v3752_v29 = vsub.f32 %v3726_v24, %v3726_v24  ;;  %v1507_v50 = vand.u32 4294901760, %v1506_v42 }
  0xed   :  { %1391 = vmatpush.msrb.mxu0 %v1296_v52  ;;  %1434 = vmatpush.msrb.mxu2 %v3582_v47  ;;  %v1496_v52 = vsub.f32 %v3662_v48, %v1495_v18 }
  0xee   :  { %1410 = vmatpush.msrb.mxu1 %v3415_v28  ;;  %1478 = vmatpush.msrb.mxu3 %v1477_v36  ;;  %v3729_v28 = vand.u32 4294901760, %v1424_v16  ;;  %v1510_v7 = vand.u32 4294901760, %v3710_v6  ;;  %v1520_v36 = vand.u32 4294901760, %v3739_v2 }
  0xef   :  { %1394 = vmatpush.msrb.mxu0 %v1301_v14  ;;  %1435 = vmatpush.msrb.mxu2 %v3598_v23  ;;  %v1501_v14 = vsub.f32 %v3679_v59, %v1500_v34  ;;  %v1497_v56 = vand.u32 4294901760, %v1496_v52 }
  0xf0   :  { %1411 = vmatpush.msrb.mxu1 %v3425_v27  ;;  %1483 = vmatpush.msrb.mxu3 %v1482_v0  ;;  %v3743_v27 = vunpack.c.l.bf16 %v1910_v49  ;;  %v1511_v8 = vsub.f32 %v3710_v6, %v1510_v7  ;;  %v1516_v0 = vsub.f32 %v3724_v41, %v1515_v51  ;;  %v1525_v49 = vand.u32 4294901760, %v3752_v29 }
  0xf1   :  { %1396 = vmatmul.f32.vlgmr.msrb.gmra.mxu0 %v3435_v61  ;;  %1436 = vmatpush.msrb.mxu2 %v3619_v39  ;;  %v1502_v55 = vand.u32 4294901760, %v1501_v14 }
  0xf2   :  { %1540 = vmatpush.msra.mxu0 %v3523_v44  ;;  %1412 = vmatpush.msrb.mxu1 %v3443_v32  ;;  %v3757_v32 = vsub.f32 %v1424_v16, %v3729_v28  ;;  %v1512_v3 = vand.u32 4294901760, %v1511_v8  ;;  %v1521_v16 = vsub.f32 %v3739_v2, %v1520_v36  ;;  %v1526_v52 = vsub.f32 %v3752_v29, %v1525_v49  ;;  %v2111_v8 = vld [vmem:[%s4036_s5 + $0x58] sm:$0xff]   ;;  %v2110_v44 = vld [vmem:[%s4036_s5 + $0x50] sm:$0xff]  }
  0xf3   :  { %1488 = vmatpush.msrb.mxu3 %v1487_v21  ;;  %1437 = vmatpush.msrb.mxu2 %v3633_v10 }
  0xf4   :  { %1542 = vmatpush.msra.mxu0 %v3541_v46  ;;  %1413 = vmatpush.msrb.mxu1 %v3456_v26  ;;  %v3768_v26 = vsub.f32 %v3743_v27, %v3743_v27 }
  0xf5   :  { %1493 = vmatpush.msrb.mxu3 %v1492_v1  ;;  %1438 = vmatpush.msrb.mxu2 %v3649_v12  ;;  %v1522_v1 = vand.u32 4294901760, %v1521_v16 }
  0xf6   :  { %1544 = vmatpush.msra.mxu0 %v3566_v60  ;;  %1414 = vmatpush.msrb.mxu1 %v3485_v20  ;;  %v1447_v20 = vand.u32 4294901760, %v3757_v32  ;;  %v1530_v21 = vand.u32 4294901760, %v3768_v26 }
  0xf7   :  { %1498 = vmatpush.msrb.mxu3 %v1497_v56  ;;  %1439 = vmatpush.msrb.mxu2 %v3664_v54  ;;  %v1527_v56 = vand.u32 4294901760, %v1526_v52 }
  0xf8   :  { %1546 = vmatpush.msra.mxu0 %v3580_v57  ;;  %1415 = vmatpush.msrb.mxu1 %v3512_v25  ;;  %v1517_v25 = vand.u32 4294901760, %v1516_v0  ;;  %v1531_v14 = vsub.f32 %v3768_v26, %v1530_v21 }
  0xf9   :  { %1503 = vmatpush.msrb.mxu3 %v1502_v55  ;;  %1417 = vmatmul.f32.vlgmr.msrb.gmra.mxu1 %v3435_v61  ;;  %v1448_v61 = vsub.f32 %v3757_v32, %v1447_v20 }
  0xfa   :  { %1548 = vmatpush.msra.mxu0 %v3596_v15  ;;  %1577 = vmatpush.msra.mxu1 %v3487_v53  ;;  %v1532_v55 = vand.u32 4294901760, %v1531_v14  ;;  %v2108_v15 = vld [vmem:[%s4036_s5 + $0x40] sm:$0xff]  }
  0xfb   :  { %1440 = vmatpush.msrb.mxu2 %v3681_v11  ;;  %1508 = vmatpush.msrb.mxu3 %v1507_v50  ;;  %v1449_v42 = vand.u32 4294901760, %v1448_v61  ;;  %v3820_v50 = vunpack.c.h.bf16 %v2111_v8 }
  0xfc   :  { %1550 = vmatpush.msra.mxu0 %v3612_v9  ;;  %1578 = vmatpush.msra.mxu1 %v3502_v62  ;;  %v1425_v9 = vld.sshfl [vmem:[#allocation1 + $0x8] sm:$0xff pattern:$0x73625140] }
  0xfd   :  { %1441 = vmatpush.msrb.mxu2 %v3695_v37  ;;  %1513 = vmatpush.msrb.mxu3 %v1512_v3  ;;  %v3841_v46 = vsub.f32 %v3820_v50, %v3820_v50 }
  0xfe   :  { %1552 = vmatpush.msra.mxu0 %v3629_v22  ;;  %1579 = vmatpush.msra.mxu1 %v3531_v58 }
  0xff   :  { %1442 = vmatpush.msrb.mxu2 %v3712_v33  ;;  %1518 = vmatpush.msrb.mxu3 %v1517_v25 }
 0x100   :  { %1554 = vmatpush.msra.mxu0 %v3647_v13  ;;  %1580 = vmatpush.msra.mxu1 %v3554_v45 }
 0x101   :  { %1443 = vmatpush.msrb.mxu2 %v3726_v24  ;;  %1523 = vmatpush.msrb.mxu3 %v1522_v1 }
 0x102   :  { %1556 = vmatpush.msra.mxu0 %v3662_v48  ;;  %1581 = vmatpush.msra.mxu1 %v3568_v43  ;;  %v3915_v48 = vunpack.c.l.bf16 %v2108_v15 }
 0x103   :  { %1444 = vmatpush.msrb.mxu2 %v3743_v27  ;;  %1528 = vmatpush.msrb.mxu3 %v1527_v56 }
 0x104   :  { %1450 = vmatmul.f32.vlgmr.msrb.gmra.mxu2 %v1449_v42  ;;  %1558 = vmatpush.msra.mxu0 %v3679_v59  ;;  %v3944_v25 = vsub.f32 %v3915_v48, %v3915_v48 }
 0x105   :  { %1582 = vmatpush.msra.mxu1 %v3582_v47  ;;  %1602 = vmatpush.msra.mxu2 %v1455_v5  ;;  %v3830_v5 = vunpack.c.l.bf16 %v2111_v8 }
 0x106   :  { %1533 = vmatpush.msrb.mxu3 %v1532_v55  ;;  %1560 = vmatpush.msra.mxu0 %v3693_v38 }
 0x107   :  { %1535 = vmatmul.f32.vlgmr.msrb.gmra.mxu3 %v3729_v28  ;;  %1583 = vmatpush.msra.mxu1 %v3598_v23  ;;  %v3855_v60 = vsub.f32 %v3830_v5, %v3830_v5 }
 0x108   :  { %1605 = vmatpush.msra.mxu2 %v1460_v30  ;;  %1653 = vmatpush.msra.mxu3 %v3487_v53  ;;  %v3837_v53 = vunpack.c.h.bf16 %v2110_v44  ;;  %v1708_v30 = vand.u32 4294901760, %v3841_v46 }
 0x109   :  { %1562 = vmatpush.msra.mxu0 %v3710_v6  ;;  %1584 = vmatpush.msra.mxu1 %v3619_v39 }
 0x10a   :  { %1608 = vmatpush.msra.mxu2 %v1465_v63  ;;  %1654 = vmatpush.msra.mxu3 %v3502_v62  ;;  %v2109_v62 = vld [vmem:[%s4036_s5 + $0x48] sm:$0xff]   ;;  %v1713_v63 = vand.u32 4294901760, %v3855_v60 }
 0x10b   :  { %1564 = vmatpush.msra.mxu0 %v3724_v41  ;;  %1585 = vmatpush.msra.mxu1 %v3633_v10  ;;  %v3863_v57 = vunpack.c.h.bf16 %v2109_v62 }
 0x10c   :  { %1611 = vmatpush.msra.mxu2 %v1470_v35  ;;  %1655 = vmatpush.msra.mxu3 %v3531_v58  ;;  %v3851_v58 = vunpack.c.l.bf16 %v2110_v44 }
 0x10d   :  { %1566 = vmatpush.msra.mxu0 %v3739_v2  ;;  %1586 = vmatpush.msra.mxu1 %v3649_v12  ;;  %v3895_v22 = vsub.f32 %v3863_v57, %v3863_v57 }
 0x10e   :  { %1614 = vmatpush.msra.mxu2 %v1475_v17  ;;  %1656 = vmatpush.msra.mxu3 %v3554_v45  ;;  %v3867_v45 = vsub.f32 %v3837_v53, %v3837_v53  ;;  %v3882_v35 = vsub.f32 %v3851_v58, %v3851_v58 }
 0x10f   :  { %1568 = vmatpush.msra.mxu0 %v3752_v29  ;;  %1587 = vmatpush.msra.mxu1 %v3664_v54  ;;  %v1728_v0 = vand.u32 4294901760, %v3895_v22 }
 0x110   :  { %1617 = vmatpush.msra.mxu2 %v1480_v31  ;;  %1657 = vmatpush.msra.mxu3 %v3568_v43  ;;  %v3875_v43 = vunpack.c.l.bf16 %v2109_v62  ;;  %v1718_v17 = vand.u32 4294901760, %v3867_v45  ;;  %v3899_v31 = vunpack.c.h.bf16 %v2108_v15  ;;  %v1723_v13 = vand.u32 4294901760, %v3882_v35 }
 0x111   :  { %1570 = vmatpush.msra.mxu0 %v3768_v26  ;;  %1588 = vmatpush.msra.mxu1 %v3681_v11  ;;  %v1729_v38 = vsub.f32 %v3895_v22, %v1728_v0  ;;  %v397_v26 = vpop.f32.mrf.mxu2 }
 0x112   :  { %1620 = vmatpush.msra.mxu2 %v1485_v40  ;;  %1658 = vmatpush.msra.mxu3 %v3582_v47  ;;  %v1709_v47 = vsub.f32 %v3841_v46, %v1708_v30  ;;  %v3910_v40 = vsub.f32 %v3875_v43, %v3875_v43  ;;  %v3928_v3 = vsub.f32 %v3899_v31, %v3899_v31 }
 0x113   :  { %1573 = vmatmul.f32.vlgmr.msra.gmra.mxu0 %v3757_v32  ;;  %1589 = vmatpush.msra.mxu1 %v3695_v37  ;;  %v1724_v59 = vsub.f32 %v3882_v35, %v1723_v13 }
 0x114   :  { %1623 = vmatpush.msra.mxu2 %v1490_v19  ;;  %1659 = vmatpush.msra.mxu3 %v3598_v23  ;;  %v1714_v23 = vsub.f32 %v3855_v60, %v1713_v63  ;;  %v1427_v19 = vsel %vm249_vm0, %v1425_v9, 0 }
 0x115   :  { %1682 = vmatpush.msrb.mxu0 %v3820_v50  ;;  %1590 = vmatpush.msra.mxu1 %v3712_v33  ;;  %v3930_v16 = vand.u32 4294901760, %v1427_v19  ;;  %v1725_v6 = vand.u32 4294901760, %v1724_v59 }
 0x116   :  { %1626 = vmatpush.msra.mxu2 %v1495_v18  ;;  %1660 = vmatpush.msra.mxu3 %v3619_v39  ;;  %v1710_v39 = vand.u32 4294901760, %v1709_v47  ;;  %v1719_v18 = vsub.f32 %v3867_v45, %v1718_v17 }
 0x117   :  { %1683 = vmatpush.msrb.mxu0 %v3830_v5  ;;  %1591 = vmatpush.msra.mxu1 %v3726_v24  ;;  %v3955_v32 = vsub.f32 %v1427_v19, %v3930_v16 }
 0x118   :  { %1629 = vmatpush.msra.mxu2 %v1500_v34  ;;  %1661 = vmatpush.msra.mxu3 %v3633_v10  ;;  %v1715_v10 = vand.u32 4294901760, %v1714_v23  ;;  %v1733_v34 = vand.u32 4294901760, %v3910_v40 }
 0x119   :  { %1684 = vmatpush.msrb.mxu0 %v3837_v53  ;;  %1592 = vmatpush.msra.mxu1 %v3743_v27  ;;  %v519_v42 = vpop.f32.mrf.mxu2 }
 0x11a   :  { %1632 = vmatpush.msra.mxu2 %v1505_v4  ;;  %1662 = vmatpush.msra.mxu3 %v3649_v12  ;;  %v1720_v12 = vand.u32 4294901760, %v1719_v18  ;;  %v1738_v4 = vand.u32 4294901760, %v3928_v3 }
 0x11b   :  { %1596 = vmatmul.f32.vlgmr.msra.gmra.mxu1 %v1447_v20  ;;  %1685 = vmatpush.msrb.mxu0 %v3851_v58  ;;  %v1730_v20 = vand.u32 4294901760, %v1729_v38 }
 0x11c   :  { %1711 = vmatpush.msrb.mxu1 %v1710_v39  ;;  %1635 = vmatpush.msra.mxu2 %v1510_v7  ;;  %v1734_v7 = vsub.f32 %v3910_v40, %v1733_v34  ;;  %v1739_v41 = vsub.f32 %v3928_v3, %v1738_v4 }
 0x11d   :  { %1663 = vmatpush.msra.mxu3 %v3664_v54  ;;  %1686 = vmatpush.msrb.mxu0 %v3863_v57  ;;  %v1743_v54 = vand.u32 4294901760, %v3944_v25 }
 0x11e   :  { %1716 = vmatpush.msrb.mxu1 %v1715_v10  ;;  %1638 = vmatpush.msra.mxu2 %v1515_v51  ;;  %v1692_v51 = vand.u32 4294901760, %v3955_v32 }
 0x11f   :  { %1664 = vmatpush.msra.mxu3 %v3681_v11  ;;  %1687 = vmatpush.msrb.mxu0 %v3875_v43  ;;  %v1735_v11 = vand.u32 4294901760, %v1734_v7  ;;  %v1744_v2 = vsub.f32 %v3944_v25, %v1743_v54 }
 0x120   :  { %1721 = vmatpush.msrb.mxu1 %v1720_v12  ;;  %1641 = vmatpush.msra.mxu2 %v1520_v36  ;;  %v1693_v36 = vsub.f32 %v3955_v32, %v1692_v51 }
 0x121   :  { %1665 = vmatpush.msra.mxu3 %v3695_v37  ;;  %1688 = vmatpush.msrb.mxu0 %v3899_v31  ;;  %v1740_v37 = vand.u32 4294901760, %v1739_v41  ;;  %v718_v62 = vpop.f32.mrf.mxu2 }
 0x122   :  { %1726 = vmatpush.msrb.mxu1 %v1725_v6  ;;  %1644 = vmatpush.msra.mxu2 %v1525_v49 }
 0x123   :  { %1666 = vmatpush.msra.mxu3 %v3712_v33  ;;  %1689 = vmatpush.msrb.mxu0 %v3915_v48  ;;  %v1745_v33 = vand.u32 4294901760, %v1744_v2 }
 0x124   :  { %1731 = vmatpush.msrb.mxu1 %v1730_v20  ;;  %1647 = vmatpush.msra.mxu2 %v1530_v21  ;;  %v420_v21 = vpop.f32.mrf.mxu3 }
 0x125   :  { %1667 = vmatpush.msra.mxu3 %v3726_v24  ;;  %1761 = vmatpush.msra.mxu0 %v3841_v46  ;;  %v1694_v24 = vand.u32 4294901760, %v1693_v36 }
 0x126   :  { %1649 = vmatmul.f32.vlgmr.msra.gmra.mxu2 %v3729_v28  ;;  %1736 = vmatpush.msrb.mxu1 %v1735_v11 }
 0x127   :  { %1668 = vmatpush.msra.mxu3 %v3743_v27  ;;  %1763 = vmatpush.msra.mxu0 %v3855_v60  ;;  %v274_v27 = vpop.f32.mrf.mxu0 }
 0x128   :  { %1815 = vmatpush.msrb.mxu2 %v1708_v30  ;;  %1670 = vmatmul.f32.vlgmr.msra.gmra.mxu3 %v3729_v28  ;;  %v359_v28 = vpop.f32.mrf.mxu1 }
 0x129   :  { %1741 = vmatpush.msrb.mxu1 %v1740_v37  ;;  %1765 = vmatpush.msra.mxu0 %v3867_v45  ;;  %v360_v29 = vadd.f32 %v359_v28, %v274_v27  ;;  %v887_v15 = vpop.f32.mrf.mxu2 }
 0x12a   :  { %1818 = vmatpush.msrb.mxu2 %v1713_v63  ;;  %1850 = vmatpush.msrb.mxu3 %v3820_v50 }
 0x12b   :  { %1746 = vmatpush.msrb.mxu1 %v1745_v33  ;;  %1767 = vmatpush.msra.mxu0 %v3882_v35  ;;  %v398_v49 = vadd.f32 %v397_v26, %v360_v29 }
 0x12c   :  { %1821 = vmatpush.msrb.mxu2 %v1718_v17  ;;  %1851 = vmatpush.msrb.mxu3 %v3830_v5  ;;  %v604_v8 = vpop.f32.mrf.mxu3 }
 0x12d   :  { %1790 = vmatpush.msra.mxu1 %v3820_v50  ;;  %1695 = vmatmul.f32.vlgmr.msrb.gmra.mxu0 %v1694_v24  ;;  %v421_v52 = vadd.f32 %v420_v21, %v398_v49 }
 0x12e   :  { %1769 = vmatpush.msra.mxu0 %v3895_v22  ;;  %1824 = vmatpush.msrb.mxu2 %v1723_v13 }
 0x12f   :  { %1791 = vmatpush.msra.mxu1 %v3830_v5  ;;  %1852 = vmatpush.msrb.mxu3 %v3837_v53  ;;  %v473_v61 = vpop.f32.mrf.mxu0 }
 0x130   :  { %1771 = vmatpush.msra.mxu0 %v3910_v40  ;;  %1827 = vmatpush.msrb.mxu2 %v1728_v0  ;;  %v474_v1 = vadd.f32 %v473_v61, %v421_v52  ;;  %v494_v14 = vpop.f32.mrf.mxu1 }
 0x131   :  { %1792 = vmatpush.msra.mxu1 %v3837_v53  ;;  %1853 = vmatpush.msrb.mxu3 %v3851_v58 }
 0x132   :  { %1773 = vmatpush.msra.mxu0 %v3928_v3  ;;  %1830 = vmatpush.msrb.mxu2 %v1733_v34  ;;  %v495_v56 = vadd.f32 %v494_v14, %v474_v1  ;;  %v1009_v13 = vpop.f32.mrf.mxu2 }
 0x133   :  { %1793 = vmatpush.msra.mxu1 %v3851_v58  ;;  %1854 = vmatpush.msrb.mxu3 %v3863_v57 }
 0x134   :  { %1748 = vmatmul.f32.vlgmr.msrb.gmra.mxu1 %v3930_v16  ;;  %1775 = vmatpush.msra.mxu0 %v3944_v25  ;;  %v520_v55 = vadd.f32 %v519_v42, %v495_v56  ;;  %v739_v60 = vpop.f32.mrf.mxu3 }
 0x135   :  { %1794 = vmatpush.msra.mxu1 %v3863_v57  ;;  %1833 = vmatpush.msrb.mxu2 %v1738_v4 }
 0x136   :  { %1855 = vmatpush.msrb.mxu3 %v3875_v43  ;;  %1778 = vmatmul.f32.vlgmr.msra.gmra.mxu0 %v3955_v32  ;;  %v605_v44 = vadd.f32 %v604_v8, %v520_v55 }
 0x137   :  { %1795 = vmatpush.msra.mxu1 %v3875_v43  ;;  %1836 = vmatpush.msrb.mxu2 %v1743_v54  ;;  %v642_v50 = vpop.f32.mrf.mxu0 }
 0x138   :  { %1856 = vmatpush.msrb.mxu3 %v3899_v31  ;;  %1838 = vmatmul.f32.vlgmr.msrb.gmra.mxu2 %v3930_v16  ;;  %v665_v5 = vpop.f32.mrf.mxu1  ;;  %v643_v53 = vadd.f32 %v642_v50, %v605_v44 }
 0x139   :  { %1796 = vmatpush.msra.mxu1 %v3899_v31 }
 0x13a   :  { %1857 = vmatpush.msrb.mxu3 %v3915_v48  ;;  %v666_v46 = vadd.f32 %v665_v5, %v643_v53 }
 0x13b   :  { %1859 = vmatmul.f32.vlgmr.msrb.gmra.mxu3 %v3930_v16  ;;  %1797 = vmatpush.msra.mxu1 %v3915_v48 }
 0x13c   :  { %1801 = vmatmul.f32.vlgmr.msra.gmra.mxu1 %v1692_v51  ;;  %v719_v58 = vadd.f32 %v718_v62, %v666_v46  ;;  %v910_v9 = vpop.f32.mrf.mxu3  ;;  %v2148_v46 = vld [vmem:[%s4038_s7] ss:$0 sm:$0xff]  ;;  %s2183_s7 = smov [#allocation2]  }
 0x13d   :  { %s1898_s12 = sshll.u32 %s2183_s7, 4  ;;  %s1899_s12 = int_to_ptr.vmem [resolvable:$true] %s1898_s12 }
 0x13e   :  { %v740_v57 = vadd.f32 %v739_v60, %v719_v58 }
 0x13f   :  { %v764_v30 = vpop.f32.mrf.mxu0 }
 0x140   :  { %v849_v45 = vpop.f32.mrf.mxu1  ;;  %v765_v63 = vadd.f32 %v764_v30, %v740_v57 }
 0x142   :  { %v850_v43 = vadd.f32 %v849_v45, %v765_v63 }
 0x144   :  { %v888_v35 = vadd.f32 %v887_v15, %v850_v43  ;;  %v1094_v19 = vpop.f32.mrf.mxu3 }
 0x146   :  { %v911_v17 = vadd.f32 %v910_v9, %v888_v35 }
 0x147   :  { %v963_v47 = vpop.f32.mrf.mxu0 }
 0x148   :  { %v984_v22 = vpop.f32.mrf.mxu1  ;;  %v964_v31 = vadd.f32 %v963_v47, %v911_v17 }
 0x14a   :  { %v985_v23 = vadd.f32 %v984_v22, %v964_v31 }
 0x14c   :  { %v1010_v40 = vadd.f32 %v1009_v13, %v985_v23 }
 0x14e   :  { %v1095_v39 = vadd.f32 %v1094_v19, %v1010_v40 }
 0x14f   :  { %v1132_v48 = vpop.f32.mrf.mxu0 }
 0x150   :  { %v1133_v0 = vadd.f32 %v1132_v48, %v1095_v39 }
 0x154   :  { %v1155_v18 = vpop.f32.mrf.mxu1  ;;  %v1208_v16 = vpop.f32.mrf.mxu2 }
 0x155   :  { %v1156_v3 = vadd.f32 %v1155_v18, %v1133_v0 }
 0x157   :  { %v1209_v10 = vadd.f32 %v1208_v16, %v1156_v3  ;;  %v1229_v59 = vpop.f32.mrf.mxu3 }
 0x159   :  { %v1230_v34 = vadd.f32 %v1229_v59, %v1209_v10 }
 0x15c   :  { %v1254_v25 = vpop.f32.mrf.mxu0 }
 0x15d   :  { %v1255_v38 = vadd.f32 %v1254_v25, %v1230_v34 }
 0x166   :  { %v1307_v12 = vpop.f32.mrf.mxu1  ;;  %v1337_v32 = vpop.f32.mrf.mxu2 }
 0x167   :  { %v1308_v4 = vadd.f32 %v1307_v12, %v1255_v38 }
 0x169   :  { %v1338_v6 = vadd.f32 %v1337_v32, %v1308_v4  ;;  %v1360_v7 = vpop.f32.mrf.mxu3 }
 0x16b   :  { %v1361_v54 = vadd.f32 %v1360_v7, %v1338_v6 }
 0x16e   :  { %v1397_v20 = vpop.f32.mrf.mxu0 }
 0x16f   :  { %v1398_v51 = vadd.f32 %v1397_v20, %v1361_v54 }
 0x176   :  { %v1418_v41 = vpop.f32.mrf.mxu1 }
 0x177   :  { %v1419_v11 = vadd.f32 %v1418_v41, %v1398_v51 }
 0x179   :  { %v1421_v37 = vperm.slane %v1419_v11, 0 }
 0x187   :  { %v1451_v2 = vpop.f32.mrf.mxu2 }
 0x188   :  { %v1452_v36 = vadd.f32 %v1451_v2, %v1421_v37 }
 0x18a   :  { %v1536_v33 = vpop.f32.mrf.mxu3 }
 0x18b   :  { %v1537_v28 = vadd.f32 %v1536_v33, %v1452_v36 }
 0x190   :  { %v1574_v24 = vpop.f32.mrf.mxu0 }
 0x191   :  { %v1575_v29 = vadd.f32 %v1574_v24, %v1537_v28 }
 0x198   :  { %v1597_v27 = vpop.f32.mrf.mxu1 }
 0x199   :  { %v1598_v26 = vadd.f32 %v1597_v27, %v1575_v29 }
 0x1a9   :  { %v1650_v49 = vpop.f32.mrf.mxu2 }
 0x1aa   :  { %v1651_v21 = vadd.f32 %v1650_v49, %v1598_v26  ;;  %v1696_v52 = vpop.f32.mrf.mxu0 }
 0x1ab   :  { %v1671_v61 = vpop.f32.mrf.mxu3 }
 0x1ac   :  { %v1672_v1 = vadd.f32 %v1671_v61, %v1651_v21 }
 0x1ae   :  { %v1697_v14 = vadd.f32 %v1696_v52, %v1672_v1 }
 0x1b1   :  { %v1749_v56 = vpop.f32.mrf.mxu1 }
 0x1b2   :  { %v1750_v42 = vadd.f32 %v1749_v56, %v1697_v14 }
 0x1b3   :  { %v1779_v55 = vpop.f32.mrf.mxu0 }
 0x1b4   :  { %v1780_v8 = vadd.f32 %v1779_v55, %v1750_v42 }
 0x1b9   :  { %v1802_v50 = vpop.f32.mrf.mxu1 }
 0x1ba   :  { %v1803_v44 = vadd.f32 %v1802_v50, %v1780_v8 }
 0x1bb   :  { %v1839_v5 = vpop.f32.mrf.mxu2 }
 0x1bc   :  { %v1840_v53 = vadd.f32 %v1839_v5, %v1803_v44 }
 0x1be   :  { %v1860_v62 = vpop.f32.mrf.mxu3 }
 0x1bf   :  { %v1861_v58 = vadd.f32 %v1860_v62, %v1840_v53 }
 0x1c1   :  { %v1867_v60 = vadd.f32 %v2148_v46, %v1861_v58 }
 0x1c3   :  { %v1868_v30 = vsel %vm43_vm1, %v1867_v60, -inf }
 0x1c4   :  { %1869 = vmax.xlane.f32.xlu0 %v1868_v30 }
 0x237   :  { %v1870_v57 = vpop.xlane.xlu0 %1869 }
 0x238   :  { %v1871_v45 = vsub.f32 %v1867_v60, %v1870_v57 }
 0x23a   :  { %v1872_v63 = vmul.f32 1.442695, %v1871_v45 }
 0x23c   :  { %2153 = vpow2.f32 %v1872_v63 }
 0x242   :  { %v2154_v43 = vpop.eup %2153 }
 0x243   :  { %v1874_v15 = vsel %vm43_vm1, %v2154_v43, 0.0 }
 0x244   :  { %1875 = vadd.xlane.f32.xlu0 %v1874_v15 }
 0x2b7   :  { %v1876_v35 = vpop.xlane.xlu0 %1875 }
 0x2b8   :  { %2155 = vrcp.f32 %v1876_v35  ;;  %v1888_v22 = vand.u32 2147483648, %v1876_v35  ;;  %v1886_v23 = vand.u32 2147483647, %v1876_v35  ;;  %vm1882_vm3 = vweird.f32 %v1876_v35 }
 0x2ba   :  { %v1889_v40 = vor.u32 1.1754944e-38, %v1888_v22  ;;  %vm1887_vm5 = vcmp.eq.f32.partialorder %v1886_v23, 8.507059e+37 }
 0x2be   :  { %v2156_v9 = vpop.eup %2155 }
 0x2bf   :  { %v1878_v47 = vmul.f32 %v2156_v9, %v1876_v35  ;;  %vm1883_vm2 = vweird.f32 %v2156_v9 }
 0x2c0   :  { %vm1884_vm4 = vmor %vm1882_vm3, %vm1883_vm2 }
 0x2c1   :  { %v1879_v17 = vsub.f32 1.0, %v1878_v47 }
 0x2c3   :  { %v1880_v31 = vmul.f32 %v2156_v9, %v1879_v17 }
 0x2c5   :  { %v1881_v13 = vadd.f32 %v2156_v9, %v1880_v31 }
 0x2c7   :  { %v1885_v19 = vsel %vm1884_vm4, %v2156_v9, %v1881_v13 }
 0x2c8   :  { %v1890_v48 = vsel %vm1887_vm5, %v1889_v40, %v1885_v19 }
 0x2c9   :  { %v1891_v39 = vmul.f32 %v2154_v43, %v1890_v48 }
 0x2cb   :  { %1892 = vst [vmem:[#allocation2] sm:$0x3] %v1891_v39 }
 0x2cc   :  { %1903 = dma.vmem_to_hbm [thread:$0]  %s1899_s12, 32, %s1901_s13, [#allocation3]  }
 0x2cd   :  { %2181 = dma.done.wait [#allocation3], 32  }
 0x2ce   :  { %2182 = vsyncadd [#allocation3], 4294967264 }
 0x2cf   :  { %1908 = vsyncpa [#allocation3], 1 }

</bundles_post_ra>
